<compile_context>
chip_gen: v7x
topology: tpu7x:2x2x1
jax: 0.10.0
libtpu: 0.0.40
codegen_flags: <defaults>
</compile_context>

<pallas_src>
import math

import jax
import jax.numpy as jnp
from jax.experimental import pallas as pl
from jax.experimental.pallas import tpu as pltpu


# ----------------------- shared-range-reduction sincos ----------------------
# Cody-Waite split of pi/2 (2x cephes sinf DP constants); q*P1 and q*P2 are
# exact in f32 for the |arg| range of diffusion timesteps (<= ~1e4).
_TWO_OVER_PI = 0.6366197723675814
_PIO2_1 = 1.5703125
_PIO2_2 = 4.837512969970703125e-4
_PIO2_3 = 7.549789954891862e-8


def _sincos(arg):
    """Returns (sin(arg), cos(arg)) with one shared range reduction."""
    q = jnp.round(arg * _TWO_OVER_PI)
    r = ((arg - q * _PIO2_1) - q * _PIO2_2) - q * _PIO2_3   # r in [-pi/4, pi/4]
    qi = q.astype(jnp.int32)
    r2 = r * r
    # cephes sinf / cosf minimax polynomials on [-pi/4, pi/4]
    sin_r = ((-1.9515295891e-4 * r2 + 8.3321608736e-3) * r2
             - 1.6666654611e-1) * r2 * r + r
    cos_r = ((2.443315711809948e-5 * r2 - 1.388731625493765e-3) * r2
             + 4.166664568298827e-2) * (r2 * r2) - 0.5 * r2 + 1.0
    # Quadrant selection (q mod 4): swap halves on odd quadrants, fix signs.
    swap = (qi & 1) == 1
    sin_v = jnp.where(swap, cos_r, sin_r)
    cos_v = jnp.where(swap, sin_r, cos_r)
    sin_v = jnp.where((qi & 2) == 2, -sin_v, sin_v)
    cos_v = jnp.where(((qi + 1) & 2) == 2, -cos_v, cos_v)
    return sin_v, cos_v


# ------------------------------ Pallas kernel ------------------------------

def _sinusoidal_pos_emb_kernel(x_ref, o_ref):
    """x_ref: [tm, 1] positions; o_ref: [tm, dim] = [sin(x*freq) | cos(x*freq)]."""
    half = o_ref.shape[-1] // 2
    scale = math.log(10000.0) / (half - 1)
    k = jax.lax.broadcasted_iota(jnp.int32, (1, half), 1).astype(jnp.float32)
    freq = jnp.exp(k * (-scale))                         # [1, half]  (EUP exp)
    arg = x_ref[...].astype(jnp.float32) * freq          # [tm, half] bcast mul
    sin_v, cos_v = _sincos(arg)                          # shared range reduction
    # Two direct lane-dense stores; no concatenated [tm, dim] temporary.
    o_ref[:, :half] = sin_v.astype(o_ref.dtype)
    o_ref[:, half:] = cos_v.astype(o_ref.dtype)


# --------------------------------- wrapper ----------------------------------

def _round_up(x, m):
    return ((x + m - 1) // m) * m


def _vmem_capacity_bytes():
    try:
        return int(pltpu.get_tpu_info().vmem_capacity_bytes)
    except Exception:
        return 64 << 20   # conservative (v7x per-TC size)


def _num_tensorcores():
    try:
        kind = jax.devices()[0].device_kind.lower()
        return 2 if "v7" in kind else 1
    except Exception:
        return 1


def _choose_row_tile(n, dim, out_itemsize, budget_bytes, num_cores):
    """Largest multiple-of-8 row tile (<=8192) whose double-buffered in+out
    footprint fits the budget; shrunk only on multi-TC chips so every core
    gets at least one grid step."""
    # Per row, double-buffered: output tile row + lane-padded [tm,1] f32 input
    # row (128 lanes * 4 B = 512 B).
    per_row = 2 * (dim * out_itemsize + 512)
    tm = min(budget_bytes // per_row, 8192)
    tm = max(8, (tm // 8) * 8)
    tm = min(tm, _round_up(n, 8))            # never bigger than the problem
    while tm > 8 and pl.cdiv(n, tm) < num_cores:
        tm = max(8, ((tm // 2) // 8) * 8)
    return tm


def sinusoidal_pos_emb(x, dim, *, out_dtype=jnp.float32, tm=None):
    """x: [N] float positions/timesteps. Returns [N, dim] embedding."""
    assert dim % 2 == 0 and dim >= 4, "dim must be even and >= 4"
    n = x.shape[0]
    out_itemsize = jnp.dtype(out_dtype).itemsize

    cap = _vmem_capacity_bytes()
    vmem_limit = min(cap // 2, 64 << 20)     # 64 MiB on v5e/v6e, 32 MiB on v7x
    if tm is None:
        tm = _choose_row_tile(n, dim, out_itemsize,
                              (vmem_limit * 3) // 4, _num_tensorcores())

    grid = pl.cdiv(n, tm)
    # Pad only the tiny input so reads of the last (possibly partial) block are
    # defined; the output is exactly (n, dim) and Pallas masks the ragged last
    # block's writeback -> no post-kernel slice / extra HBM copy.
    x_col = x.astype(jnp.float32).reshape(n, 1)
    n_in = grid * tm
    if n_in != n:
        x_col = jnp.pad(x_col, ((0, n_in - n), (0, 0)))

    return pl.pallas_call(
        _sinusoidal_pos_emb_kernel,
        out_shape=jax.ShapeDtypeStruct((n, dim), out_dtype),
        grid=(grid,),
        in_specs=[pl.BlockSpec((tm, 1), lambda i: (i, 0))],
        out_specs=pl.BlockSpec((tm, dim), lambda i: (i, 0)),
        compiler_params=pltpu.CompilerParams(
            dimension_semantics=("parallel",),
            vmem_limit_bytes=vmem_limit),
    )(x_col)


# ----------------------------- pure-JAX reference ---------------------------

def _ref_sinusoidal_pos_emb(x, dim):
    half = dim // 2
    scale = math.log(10000.0) / (half - 1)
    freq = jnp.exp(jnp.arange(half, dtype=jnp.float32) * (-scale))
    arg = x.astype(jnp.float32)[:, None] * freq[None, :]
    return jnp.concatenate([jnp.sin(arg), jnp.cos(arg)], axis=-1)


# ----------------------------------- main ------------------------------------

if __name__ == "__main__":
    # Small shapes consistent with the module: a 1-D batch of timesteps,
    # lane-dense embedding dim (multiple of 128).
    N, DIM = 200, 256   # N deliberately NOT a tile multiple (exercises masking)

    key = jax.random.PRNGKey(0)
    x = jax.random.uniform(key, (N,), jnp.float32, minval=0.0, maxval=100.0)

    out = sinusoidal_pos_emb(x, DIM)
    out = jax.block_until_ready(out)

    ref = _ref_sinusoidal_pos_emb(x, DIM)
    assert out.shape == (N, DIM), out.shape
    assert bool(jnp.all(jnp.isfinite(out)))
    assert bool(jnp.allclose(out, ref, atol=1e-4, rtol=1e-4))

    print("KERNEL_OK")
</pallas_src>

<mosaic_0001>
module attributes {stable_mosaic.version = 11 : i64} {
  func.func @_sinusoidal_pos_emb_kernel(%arg0: i32, %arg1: memref<200x1xf32, #tpu.memory_space<vmem>>, %arg2: memref<200x256xf32, #tpu.memory_space<vmem>>) attributes {dimension_semantics = [#tpu.dimension_semantics<parallel>], iteration_bounds = array<i64: 1>, scalar_prefetch = 0 : i64, scratch_operands = 0 : i64, tpu.core_type = #tpu.core_type<tc>, window_params = [{transform_indices = @transform_0, window_bounds = array<i64: 200, 1>}, {transform_indices = @transform_1, window_bounds = array<i64: 200, 256>}]} {
    %0 = tpu.iota {dimensions = array<i32: 1>} : vector<1x128xi32>
    %1 = arith.sitofp %0 : vector<1x128xi32> to vector<1x128xf32>
    %cst = arith.constant -0.0725223646 : f32
    %2 = vector.broadcast %cst : f32 to vector<1x128xf32>
    %3 = arith.mulf %1, %2 : vector<1x128xf32>
    %4 = math.exp %3 : vector<1x128xf32>
    %c0 = arith.constant 0 : index
    %c0_0 = arith.constant 0 : index
    %5 = vector.load %arg1[%c0, %c0_0] : memref<200x1xf32, #tpu.memory_space<vmem>>, vector<200x1xf32>
    %6 = vector.broadcast %5 : vector<200x1xf32> to vector<200x128xf32>
    %7 = vector.broadcast %4 : vector<1x128xf32> to vector<200x128xf32>
    %8 = arith.mulf %6, %7 : vector<200x128xf32>
    %cst_1 = arith.constant 0.636619746 : f32
    %9 = vector.broadcast %cst_1 : f32 to vector<200x128xf32>
    %10 = arith.mulf %8, %9 : vector<200x128xf32>
    %11 = math.roundeven %10 : vector<200x128xf32>
    %cst_2 = arith.constant 1.5703125 : f32
    %12 = vector.broadcast %cst_2 : f32 to vector<200x128xf32>
    %13 = arith.mulf %11, %12 : vector<200x128xf32>
    %14 = arith.subf %8, %13 : vector<200x128xf32>
    %cst_3 = arith.constant 4.83751297E-4 : f32
    %15 = vector.broadcast %cst_3 : f32 to vector<200x128xf32>
    %16 = arith.mulf %11, %15 : vector<200x128xf32>
    %17 = arith.subf %14, %16 : vector<200x128xf32>
    %cst_4 = arith.constant 7.549790e-08 : f32
    %18 = vector.broadcast %cst_4 : f32 to vector<200x128xf32>
    %19 = arith.mulf %11, %18 : vector<200x128xf32>
    %20 = arith.subf %17, %19 : vector<200x128xf32>
    %21 = arith.fptosi %11 : vector<200x128xf32> to vector<200x128xi32>
    %22 = arith.mulf %20, %20 : vector<200x128xf32>
    %cst_5 = arith.constant -1.95152956E-4 : f32
    %23 = vector.broadcast %cst_5 : f32 to vector<200x128xf32>
    %24 = arith.mulf %23, %22 : vector<200x128xf32>
    %cst_6 = arith.constant 0.00833216123 : f32
    %25 = vector.broadcast %cst_6 : f32 to vector<200x128xf32>
    %26 = arith.addf %24, %25 : vector<200x128xf32>
    %27 = arith.mulf %26, %22 : vector<200x128xf32>
    %cst_7 = arith.constant 0.166666552 : f32
    %28 = vector.broadcast %cst_7 : f32 to vector<200x128xf32>
    %29 = arith.subf %27, %28 : vector<200x128xf32>
    %30 = arith.mulf %29, %22 : vector<200x128xf32>
    %31 = arith.mulf %30, %20 : vector<200x128xf32>
    %32 = arith.addf %31, %20 : vector<200x128xf32>
    %cst_8 = arith.constant 2.44331568E-5 : f32
    %33 = vector.broadcast %cst_8 : f32 to vector<200x128xf32>
    %34 = arith.mulf %33, %22 : vector<200x128xf32>
    %cst_9 = arith.constant 0.00138873165 : f32
    %35 = vector.broadcast %cst_9 : f32 to vector<200x128xf32>
    %36 = arith.subf %34, %35 : vector<200x128xf32>
    %37 = arith.mulf %36, %22 : vector<200x128xf32>
    %cst_10 = arith.constant 0.0416666456 : f32
    %38 = vector.broadcast %cst_10 : f32 to vector<200x128xf32>
    %39 = arith.addf %37, %38 : vector<200x128xf32>
    %40 = arith.mulf %22, %22 : vector<200x128xf32>
    %41 = arith.mulf %39, %40 : vector<200x128xf32>
    %cst_11 = arith.constant 5.000000e-01 : f32
    %42 = vector.broadcast %cst_11 : f32 to vector<200x128xf32>
    %43 = arith.mulf %42, %22 : vector<200x128xf32>
    %44 = arith.subf %41, %43 : vector<200x128xf32>
    %cst_12 = arith.constant 1.000000e+00 : f32
    %45 = vector.broadcast %cst_12 : f32 to vector<200x128xf32>
    %46 = arith.addf %44, %45 : vector<200x128xf32>
    %c1_i32 = arith.constant 1 : i32
    %47 = vector.broadcast %c1_i32 : i32 to vector<200x128xi32>
    %48 = arith.andi %21, %47 : vector<200x128xi32>
    %c1_i32_13 = arith.constant 1 : i32
    %49 = vector.broadcast %c1_i32_13 : i32 to vector<200x128xi32>
    %50 = arith.cmpi eq, %48, %49 : vector<200x128xi32>
    %51 = arith.select %50, %46, %32 : vector<200x128xi1>, vector<200x128xf32>
    %52 = arith.select %50, %32, %46 : vector<200x128xi1>, vector<200x128xf32>
    %c2_i32 = arith.constant 2 : i32
    %53 = vector.broadcast %c2_i32 : i32 to vector<200x128xi32>
    %54 = arith.andi %21, %53 : vector<200x128xi32>
    %c2_i32_14 = arith.constant 2 : i32
    %55 = vector.broadcast %c2_i32_14 : i32 to vector<200x128xi32>
    %56 = arith.cmpi eq, %54, %55 : vector<200x128xi32>
    %cst_15 = arith.constant 0.000000e+00 : f32
    %57 = vector.broadcast %cst_15 : f32 to vector<200x128xf32>
    %58 = arith.subf %57, %51 : vector<200x128xf32>
    %59 = arith.select %56, %58, %51 : vector<200x128xi1>, vector<200x128xf32>
    %c1_i32_16 = arith.constant 1 : i32
    %60 = vector.broadcast %c1_i32_16 : i32 to vector<200x128xi32>
    %61 = arith.addi %21, %60 : vector<200x128xi32>
    %c2_i32_17 = arith.constant 2 : i32
    %62 = vector.broadcast %c2_i32_17 : i32 to vector<200x128xi32>
    %63 = arith.andi %61, %62 : vector<200x128xi32>
    %c2_i32_18 = arith.constant 2 : i32
    %64 = vector.broadcast %c2_i32_18 : i32 to vector<200x128xi32>
    %65 = arith.cmpi eq, %63, %64 : vector<200x128xi32>
    %cst_19 = arith.constant 0.000000e+00 : f32
    %66 = vector.broadcast %cst_19 : f32 to vector<200x128xf32>
    %67 = arith.subf %66, %52 : vector<200x128xf32>
    %68 = arith.select %65, %67, %52 : vector<200x128xi1>, vector<200x128xf32>
    %c0_20 = arith.constant 0 : index
    %c0_21 = arith.constant 0 : index
    %69 = vector.load %arg2[%c0_20, %c0_21] : memref<200x256xf32, #tpu.memory_space<vmem>>, vector<200x128xf32>
    tpu.vector_store %arg2[%c0_20, %c0_21], %59 {strides = array<i32>} : memref<200x256xf32, #tpu.memory_space<vmem>>, vector<200x128xf32>,
    %c0_22 = arith.constant 0 : index
    %c128 = arith.constant 128 : index
    %70 = vector.load %arg2[%c0_22, %c128] : memref<200x256xf32, #tpu.memory_space<vmem>>, vector<200x128xf32>
    tpu.vector_store %arg2[%c0_22, %c128], %68 {strides = array<i32>} : memref<200x256xf32, #tpu.memory_space<vmem>>, vector<200x128xf32>,
    return
  }
  func.func @transform_0(%arg0: i32) -> (i32, i32) {
    %c0_i32 = arith.constant 0 : i32
    %c0_i32_0 = arith.constant 0 : i32
    return %arg0, %c0_i32 : i32, i32
  }
  func.func @transform_1(%arg0: i32) -> (i32, i32) {
    %c0_i32 = arith.constant 0 : i32
    %c0_i32_0 = arith.constant 0 : i32
    return %arg0, %c0_i32 : i32, i32
  }
}

</mosaic_0001>

<bundles_post_ra>
// kernel: tpu_custom_call.1
= control target key start
LH: loop header
LB: loop body
LE: loop exit
PB: predicated region body
PF: predicated region fallthrough
CT: control target
= control target key end

     0   :  { %v1413_v2 = vmov 0   ;;  %s2158_s0 = inlined_call_operand.vmem [shape: f32[200,1], index: 0, kind: input, shape index: {}]   ;;  %s2159_s1 = inlined_call_operand.hbm [shape: f32[200,256], index: 1, kind: output, shape index: {}]  }
   0x1   :  { %v17_v0 = vld [vmem:[%s2158_s0 + $0x10] sm:$0xff]  ;;  %v15_v1 = vld [vmem:[%s2158_s0] sm:$0xff]  ;;  %1386 = vset.pattern.permute.xlu1 %v1413_v2  ;;  %1385 = vset.pattern.permute.xlu0 %v1413_v2  ;;  %v18_v3 = vld [vmem:[%s2158_s0 + $0x18] sm:$0xff] }
   0x2   :  { %52 = vperm.xlu1 %1386, %v17_v0   ;;  %42 = vperm.xlu0 %1385, %v15_v1   ;;  %v16_v4 = vld [vmem:[%s2158_s0 + $0x8] sm:$0xff]  ;;  %v19_v6 = vld [vmem:[%s2158_s0 + $0x20] sm:$0xff] }
   0x3   :  { %v20_v5 = vld [vmem:[%s2158_s0 + $0x28] sm:$0xff] }
   0x6   :  { %57 = vperm.xlu1 %1386, %v18_v3   ;;  %47 = vperm.xlu0 %1385, %v16_v4  }
   0x7   :  { %6 = vsyncpa [#allocation3], 0  ;;  %v22_v7 = vld [vmem:[%s2158_s0 + $0x38] sm:$0xff]  ;;  %v21_v8 = vld [vmem:[%s2158_s0 + $0x30] sm:$0xff]  ;;  %v9_v26 = vlaneseq }
   0x8   :  { %v24_v9 = vld [vmem:[%s2158_s0 + $0x48] sm:$0xff]  ;;  %v23_v10 = vld [vmem:[%s2158_s0 + $0x40] sm:$0xff]  ;;  %v26_v11 = vld [vmem:[%s2158_s0 + $0x58] sm:$0xff] }
   0x9   :  { %v25_v12 = vld [vmem:[%s2158_s0 + $0x50] sm:$0xff]  ;;  %v28_v13 = vld [vmem:[%s2158_s0 + $0x68] sm:$0xff]  ;;  %v27_v14 = vld [vmem:[%s2158_s0 + $0x60] sm:$0xff]  ;;  %v10_v27 = vand.u32 127, %v9_v26 }
   0xa   :  { %67 = vperm.xlu1 %1386, %v20_v5   ;;  %62 = vperm.xlu0 %1385, %v19_v6   ;;  %v30_v15 = vld [vmem:[%s2158_s0 + $0x78] sm:$0xff]  ;;  %v29_v16 = vld [vmem:[%s2158_s0 + $0x70] sm:$0xff]  ;;  %v32_v17 = vld [vmem:[%s2158_s0 + $0x88] sm:$0xff] }
   0xb   :  { %v31_v18 = vld [vmem:[%s2158_s0 + $0x80] sm:$0xff]  ;;  %v34_v19 = vld [vmem:[%s2158_s0 + $0x98] sm:$0xff]  ;;  %v33_v20 = vld [vmem:[%s2158_s0 + $0x90] sm:$0xff]  ;;  %v11_v28 = vcvt.s32.f32 %v10_v27 }
   0xc   :  { %v36_v21 = vld [vmem:[%s2158_s0 + $0xa8] sm:$0xff]  ;;  %v35_v22 = vld [vmem:[%s2158_s0 + $0xa0] sm:$0xff]  ;;  %v38_v23 = vld [vmem:[%s2158_s0 + $0xb8] sm:$0xff] }
   0xd   :  { %v37_v24 = vld [vmem:[%s2158_s0 + $0xb0] sm:$0xff]  ;;  %v39_v25 = vld [vmem:[%s2158_s0 + $0xc0] sm:$0xff]  ;;  %v12_v29 = vmul.f32 -0.072522365, %v11_v28  ;;  %s1414_s0 = smov [#allocation2]  }
   0xe   :  { %77 = vperm.xlu1 %1386, %v22_v7   ;;  %72 = vperm.xlu0 %1385, %v21_v8   ;;  %s1220_s27 = sshll.u32 %s1414_s0, 4  ;;  %s1221_s27 = int_to_ptr.vmem [resolvable:$true] %s1220_s27 }
   0xf   :  { %v13_v30 = vmul.f32 1.442695, %v12_v29  ;;  %s1389_s28 = scalar_lea.vmem %s1221_s27, 6400  ;;  %p1394_p1 = scmp.lt.s32.totalorder %s1221_s27, %s1221_s27 }
  0x10   :  { %p1390_p0 = scmp.ne.s32.totalorder %s1221_s27, %s1389_s28  ;;  %p1395_p2 = scmp.lt.s32.totalorder %s1389_s28, %s1389_s28 }
  0x11   :  { %1387 = vpow2.f32 %v13_v30 }
  0x12   :  { %87 = vperm.xlu1 %1386, %v24_v9   ;;  %82 = vperm.xlu0 %1385, %v23_v10   ;;  %p1396_p3 = por %p1395_p2, %p1394_p1 }
  0x14   :  { %p1397_p4 = pnand %p1396_p3, %p1390_p0 }
  0x16   :  { %97 = vperm.xlu1 %1386, %v26_v11   ;;  %92 = vperm.xlu0 %1385, %v25_v12  }
  0x1a   :  { %107 = vperm.xlu1 %1386, %v28_v13   ;;  %102 = vperm.xlu0 %1385, %v27_v14  }
  0x1b   :  { %v1502_v31 = vpop.eup %1387 }
  0x1e   :  { %117 = vperm.xlu1 %1386, %v30_v15   ;;  %112 = vperm.xlu0 %1385, %v29_v16  }
  0x22   :  { %127 = vperm.xlu1 %1386, %v32_v17   ;;  %122 = vperm.xlu0 %1385, %v31_v18  }
  0x26   :  { %137 = vperm.xlu1 %1386, %v34_v19   ;;  %132 = vperm.xlu0 %1385, %v33_v20  }
  0x2a   :  { %147 = vperm.xlu1 %1386, %v36_v21   ;;  %142 = vperm.xlu0 %1385, %v35_v22  }
  0x2e   :  { %157 = vperm.xlu1 %1386, %v38_v23   ;;  %152 = vperm.xlu0 %1385, %v37_v24  }
  0x32   :  { %162 = vperm.xlu0 %1385, %v39_v25  }
  0x81   :  { %v53_v32 = vpop.permute.xlu1 %52  ;;  %v43_v33 = vpop.permute.xlu0 %42 }
  0x82   :  { %v167_v34 = vmul.f32 %v1502_v31, %v53_v32  ;;  %v165_v35 = vmul.f32 %v1502_v31, %v43_v33 }
  0x84   :  { %v192_v36 = vmul.f32 0.63661975, %v167_v34  ;;  %v190_v37 = vmul.f32 0.63661975, %v165_v35 }
  0x85   :  { %v58_v38 = vpop.permute.xlu1 %57  ;;  %v48_v41 = vpop.permute.xlu0 %47 }
  0x86   :  { %v1283_v39 = vround.rtne.f32 %v192_v36  ;;  %v1281_v40 = vround.rtne.f32 %v190_v37  ;;  %v1506_v44 = vcvt.f32.s32 %v192_v36  ;;  %v168_v45 = vmul.f32 %v1502_v31, %v58_v38 }
  0x87   :  { %v1509_v47 = vcvt.f32.s32 %v190_v37  ;;  %v1512_v50 = vmul.f32 %v1502_v31, %v48_v41 }
  0x88   :  { %v242_v42 = vmul.f32 1.5703125, %v1283_v39  ;;  %v292_v43 = vmul.f32 0.0004837513, %v1283_v39  ;;  %v240_v46 = vmul.f32 1.5703125, %v1281_v40  ;;  %v342_v49 = vmul.f32 7.54979e-08, %v1283_v39 }
  0x89   :  { %v290_v52 = vmul.f32 0.0004837513, %v1281_v40  ;;  %v1042_v54 = vadd.s32 1, %v1506_v44  ;;  %v193_v55 = vmul.f32 0.63661975, %v168_v45  ;;  %v340_v57 = vmul.f32 7.54979e-08, %v1281_v40  ;;  %v68_v5 = vpop.permute.xlu1 %67 }
  0x8a   :  { %v267_v48 = vsub.f32 %v167_v34, %v242_v42  ;;  %v265_v51 = vsub.f32 %v165_v35, %v240_v46  ;;  %v1040_v58 = vadd.s32 1, %v1509_v47  ;;  %v191_v61 = vmul.f32 0.63661975, %v1512_v50 }
  0x8b   :  { %v1284_v60 = vround.rtne.f32 %v193_v55  ;;  %v842_v62 = vand.u32 1, %v1506_v44  ;;  %v942_v63 = vand.u32 2, %v1506_v44  ;;  %v1067_v2 = vand.u32 2, %v1042_v54 }
  0x8c   :  { %v317_v53 = vsub.f32 %v267_v48, %v292_v43  ;;  %v315_v56 = vsub.f32 %v265_v51, %v290_v52  ;;  %v840_v3 = vand.u32 1, %v1509_v47  ;;  %v940_v7 = vand.u32 2, %v1509_v47 }
  0x8d   :  { %v243_v4 = vmul.f32 1.5703125, %v1284_v60  ;;  %v1065_v8 = vand.u32 2, %v1040_v58  ;;  %v1529_v9 = vcvt.f32.s32 %v193_v55  ;;  %v1282_v12 = vround.rtne.f32 %v191_v61  ;;  %v78_v54 = vpop.permute.xlu1 %77 }
  0x8e   :  { %v1516_v59 = vsub.f32 %v317_v53, %v342_v49  ;;  %v1521_v0 = vsub.f32 %v315_v56, %v340_v57  ;;  %v1531_v13 = vcvt.f32.s32 %v191_v61  ;;  %v293_v16 = vmul.f32 0.0004837513, %v1284_v60 }
  0x8f   :  { %v1534_v17 = vmul.f32 %v1502_v31, %v68_v5  ;;  %v268_v20 = vsub.f32 %v168_v45, %v243_v4  ;;  %v343_v21 = vmul.f32 7.54979e-08, %v1284_v60  ;;  %v843_v24 = vand.u32 1, %v1529_v9 }
  0x90   :  { %v417_v1 = vmul.f32 %v1516_v59, %v1516_v59  ;;  %v415_v6 = vmul.f32 %v1521_v0, %v1521_v0  ;;  %v943_v25 = vand.u32 2, %v1529_v9  ;;  %v241_v29 = vmul.f32 1.5703125, %v1282_v12 }
  0x91   :  { %v318_v28 = vsub.f32 %v268_v20, %v293_v16  ;;  %vm1538_vm0 = vcmp.eq.s32.totalorder %v842_v62, 1  ;;  %vm1542_vm1 = vcmp.eq.s32.totalorder %v840_v3, 1  ;;  %v1043_v43 = vadd.s32 1, %v1529_v9 }
  0x92   :  { %v442_v10 = vmul.f32 -0.00019515296, %v417_v1  ;;  %v617_v11 = vmul.f32 2.4433157e-05, %v417_v1  ;;  %v440_v14 = vmul.f32 -0.00019515296, %v415_v6  ;;  %v717_v30 = vmul.f32 %v417_v1, %v417_v1 }
  0x93   :  { %v615_v15 = vmul.f32 2.4433157e-05, %v415_v6  ;;  %v715_v35 = vmul.f32 %v415_v6, %v415_v6  ;;  %v1546_v39 = vsub.f32 %v318_v28, %v343_v21  ;;  %v266_v40 = vsub.f32 %v1512_v50, %v241_v29 }
  0x94   :  { %v467_v18 = vadd.f32 0.008332161, %v442_v10  ;;  %v1258_v19 = vadd.f32 -0.0013887316, %v617_v11  ;;  %v465_v22 = vadd.f32 0.008332161, %v440_v14 }
  0x95   :  { %v1256_v23 = vadd.f32 -0.0013887316, %v615_v15  ;;  %v291_v44 = vmul.f32 0.0004837513, %v1282_v12  ;;  %v767_v47 = vmul.f32 0.5, %v417_v1  ;;  %vm1550_vm2 = vcmp.eq.s32.totalorder %v942_v63, 2 }
  0x96   :  { %v492_v26 = vmul.f32 %v467_v18, %v417_v1  ;;  %v667_v27 = vmul.f32 %v1258_v19, %v417_v1  ;;  %v490_v33 = vmul.f32 %v465_v22, %v415_v6  ;;  %vm1554_vm3 = vcmp.eq.s32.totalorder %v1067_v2, 2 }
  0x97   :  { %v665_v34 = vmul.f32 %v1256_v23, %v415_v6  ;;  %v418_v51 = vmul.f32 %v1546_v39, %v1546_v39  ;;  %v765_v53 = vmul.f32 0.5, %v415_v6  ;;  %vm1560_vm4 = vcmp.eq.s32.totalorder %v940_v7, 2 }
  0x98   :  { %v1233_v36 = vadd.f32 -0.16666655, %v492_v26  ;;  %v692_v37 = vadd.f32 0.041666646, %v667_v27  ;;  %v1231_v41 = vadd.f32 -0.16666655, %v490_v33  ;;  %v316_v56 = vsub.f32 %v266_v40, %v291_v44 }
  0x99   :  { %v690_v42 = vadd.f32 0.041666646, %v665_v34  ;;  %vm1564_vm5 = vcmp.eq.s32.totalorder %v1065_v8, 2  ;;  %v443_v60 = vmul.f32 -0.00019515296, %v418_v51  ;;  %v718_v10 = vmul.f32 %v418_v51, %v418_v51 }
  0x9a   :  { %v542_v45 = vmul.f32 %v1233_v36, %v417_v1  ;;  %v742_v46 = vmul.f32 %v717_v30, %v692_v37  ;;  %v540_v50 = vmul.f32 %v1231_v41, %v415_v6  ;;  %v618_v61 = vmul.f32 2.4433157e-05, %v418_v51 }
  0x9b   :  { %v740_v52 = vmul.f32 %v715_v35, %v690_v42  ;;  %v1068_v1 = vand.u32 2, %v1043_v43  ;;  %v341_v2 = vmul.f32 7.54979e-08, %v1282_v12  ;;  %v468_v5 = vadd.f32 0.008332161, %v443_v60  ;;  %v63_v35 = vpop.permute.xlu0 %62 }
  0x9c   :  { %v567_v57 = vmul.f32 %v542_v45, %v1516_v59  ;;  %v792_v58 = vsub.f32 %v742_v46, %v767_v47  ;;  %v565_v62 = vmul.f32 %v540_v50, %v1521_v0  ;;  %v1259_v6 = vadd.f32 -0.0013887316, %v618_v61 }
  0x9d   :  { %v790_v63 = vsub.f32 %v740_v52, %v765_v53  ;;  %v1572_v11 = vsub.f32 %v316_v56, %v341_v2  ;;  %v493_v16 = vmul.f32 %v468_v5, %v418_v51  ;;  %v768_v28 = vmul.f32 0.5, %v418_v51 }
  0x9e   :  { %v592_v3 = vadd.f32 %v567_v57, %v1516_v59  ;;  %v817_v4 = vadd.f32 1.0, %v792_v58  ;;  %v590_v7 = vadd.f32 %v565_v62, %v1521_v0  ;;  %v668_v18 = vmul.f32 %v1259_v6, %v418_v51 }
  0x9f   :  { %v815_v8 = vadd.f32 1.0, %v790_v63  ;;  %v1234_v22 = vadd.f32 -0.16666655, %v493_v16  ;;  %v416_v29 = vmul.f32 %v1572_v11, %v1572_v11  ;;  %vm1594_vm6 = vcmp.eq.s32.totalorder %v843_v24, 1 }
  0xa0   :  { %v892_v14 = vsel %vm1538_vm0, %v817_v4, %v592_v3  ;;  %v917_v15 = vsel %vm1538_vm0, %v592_v3, %v817_v4  ;;  %v693_v23 = vadd.f32 0.041666646, %v668_v18  ;;  %vm1600_vm7 = vcmp.eq.s32.totalorder %v943_v25, 2 }
  0xa1   :  { %v992_v12 = vsub.f32 0.0, %v892_v14  ;;  %v1117_v19 = vsub.f32 0.0, %v917_v15  ;;  %v890_v59 = vsel %vm1542_vm1, %v815_v8, %v590_v7  ;;  %v915_v0 = vsel %vm1542_vm1, %v590_v7, %v815_v8 }
  0xa2   :  { %v990_v20 = vsub.f32 0.0, %v890_v59  ;;  %v1115_v21 = vsub.f32 0.0, %v915_v0  ;;  %v543_v33 = vmul.f32 %v1234_v22, %v418_v51  ;;  %v743_v34 = vmul.f32 %v718_v10, %v693_v23 }
  0xa3   :  { %v1017_v26 = vsel %vm1550_vm2, %v992_v12, %v892_v14  ;;  %v1142_v27 = vsel %vm1554_vm3, %v1117_v19, %v917_v15  ;;  %v441_v38 = vmul.f32 -0.00019515296, %v416_v29  ;;  %v616_v40 = vmul.f32 2.4433157e-05, %v416_v29 }
  0xa4   :  { %1167 = vst [vmem:[#allocation2 + $0x20] sm:$0xff] %v1017_v26  ;;  %1192 = vst [vmem:[#allocation2 + $0x28] sm:$0xff] %v1142_v27  ;;  %v1015_v30 = vsel %vm1560_vm4, %v990_v20, %v890_v59  ;;  %v1140_v32 = vsel %vm1564_vm5, %v1115_v21, %v915_v0  ;;  %v568_v41 = vmul.f32 %v543_v33, %v1546_v39  ;;  %vm1605_vm8 = vcmp.eq.s32.totalorder %v1068_v1, 2 }
  0xa5   :  { %1165 = vst [vmem:[#allocation2] sm:$0xff] %v1015_v30  ;;  %1190 = vst [vmem:[#allocation2 + $0x8] sm:$0xff] %v1140_v32  ;;  %v793_v42 = vsub.f32 %v743_v34, %v768_v28  ;;  %v195_v24 = vmul.f32 0.63661975, %v1534_v17  ;;  %v466_v44 = vadd.f32 0.008332161, %v441_v38  ;;  %v169_v9 = vmul.f32 %v1502_v31, %v63_v35 }
  0xa6   :  { %v1257_v45 = vadd.f32 -0.0013887316, %v616_v40  ;;  %v841_v46 = vand.u32 1, %v1531_v13  ;;  %v593_v25 = vadd.f32 %v568_v41, %v1546_v39  ;;  %v941_v48 = vand.u32 2, %v1531_v13 }
  0xa7   :  { %v818_v47 = vadd.f32 1.0, %v793_v42  ;;  %v1286_v49 = vround.rtne.f32 %v195_v24  ;;  %v491_v51 = vmul.f32 %v466_v44, %v416_v29  ;;  %v716_v52 = vmul.f32 %v416_v29, %v416_v29 }
  0xa8   :  { %v666_v50 = vmul.f32 %v1257_v45, %v416_v29  ;;  %v1041_v53 = vadd.s32 1, %v1531_v13  ;;  %v194_v58 = vmul.f32 0.63661975, %v169_v9  ;;  %v766_v63 = vmul.f32 0.5, %v416_v29 }
  0xa9   :  { %v893_v55 = vsel %vm1594_vm6, %v818_v47, %v593_v25  ;;  %v918_v56 = vsel %vm1594_vm6, %v593_v25, %v818_v47  ;;  %v245_v57 = vmul.f32 1.5703125, %v1286_v49  ;;  %v1232_v61 = vadd.f32 -0.16666655, %v491_v51 }
  0xaa   :  { %v993_v60 = vsub.f32 0.0, %v893_v55  ;;  %v1118_v39 = vsub.f32 0.0, %v918_v56  ;;  %v691_v62 = vadd.f32 0.041666646, %v666_v50  ;;  %v295_v2 = vmul.f32 0.0004837513, %v1286_v49 }
  0xab   :  { %v270_v1 = vsub.f32 %v1534_v17, %v245_v57  ;;  %v1621_v3 = vmul.f32 %v1502_v31, %v78_v54  ;;  %v541_v5 = vmul.f32 %v1232_v61, %v416_v29  ;;  %v1066_v7 = vand.u32 2, %v1041_v53  ;;  %v73_v53 = vpop.permute.xlu0 %72 }
  0xac   :  { %v1018_v13 = vsel %vm1600_vm7, %v993_v60, %v893_v55  ;;  %v1143_v4 = vsel %vm1605_vm8, %v1118_v39, %v918_v56  ;;  %v741_v6 = vmul.f32 %v716_v52, %v691_v62  ;;  %v345_v10 = vmul.f32 7.54979e-08, %v1286_v49 }
  0xad   :  { %1168 = vst [vmem:[#allocation2 + $0x30] sm:$0xff] %v1018_v13  ;;  %1193 = vst [vmem:[#allocation2 + $0x38] sm:$0xff] %v1143_v4  ;;  %v320_v8 = vsub.f32 %v270_v1, %v295_v2  ;;  %v1323_v14 = vcvt.f32.s32 %v195_v24  ;;  %v566_v17 = vmul.f32 %v541_v5, %v1572_v11  ;;  %v1285_v16 = vround.rtne.f32 %v194_v58  ;;  %v88_v5 = vpop.permute.xlu1 %87 }
  0xae   :  { %v791_v15 = vsub.f32 %v741_v6, %v766_v63  ;;  %vm866_vm9 = vcmp.eq.s32.totalorder %v841_v46, 1  ;;  %vm1631_vm10 = vcmp.eq.s32.totalorder %v941_v48, 2  ;;  %vm1635_vm11 = vcmp.eq.s32.totalorder %v1066_v7, 2 }
  0xaf   :  { %v1628_v18 = vsub.f32 %v320_v8, %v345_v10  ;;  %v591_v12 = vadd.f32 %v566_v17, %v1572_v11  ;;  %v244_v0 = vmul.f32 1.5703125, %v1285_v16  ;;  %v1045_v22 = vadd.s32 1, %v1323_v14 }
  0xb0   :  { %v816_v19 = vadd.f32 1.0, %v791_v15  ;;  %v197_v23 = vmul.f32 0.63661975, %v1621_v3  ;;  %v294_v11 = vmul.f32 0.0004837513, %v1285_v16  ;;  %v845_v34 = vand.u32 1, %v1323_v14 }
  0xb1   :  { %v420_v21 = vmul.f32 %v1628_v18, %v1628_v18  ;;  %v269_v28 = vsub.f32 %v169_v9, %v244_v0  ;;  %v344_v36 = vmul.f32 7.54979e-08, %v1285_v16  ;;  %v1320_v37 = vcvt.f32.s32 %v194_v58 }
  0xb2   :  { %v891_v26 = vsel %vm866_vm9, %v816_v19, %v591_v12  ;;  %v916_v27 = vsel %vm866_vm9, %v591_v12, %v816_v19  ;;  %v1288_v24 = vround.rtne.f32 %v197_v23  ;;  %v945_v46 = vand.u32 2, %v1323_v14 }
  0xb3   :  { %v991_v29 = vsub.f32 0.0, %v891_v26  ;;  %v1116_v30 = vsub.f32 0.0, %v916_v27  ;;  %v445_v32 = vmul.f32 -0.00019515296, %v420_v21  ;;  %v620_v33 = vmul.f32 2.4433157e-05, %v420_v21 }
  0xb4   :  { %v319_v35 = vsub.f32 %v269_v28, %v294_v11  ;;  %v1070_v9 = vand.u32 2, %v1045_v22  ;;  %vm1648_vm12 = vcmp.eq.s32.totalorder %v845_v34, 1  ;;  %v247_v48 = vmul.f32 1.5703125, %v1288_v24 }
  0xb5   :  { %v1016_v38 = vsel %vm1631_vm10, %v991_v29, %v891_v26  ;;  %v1141_v40 = vsel %vm1635_vm11, %v1116_v30, %v916_v27  ;;  %v470_v41 = vadd.f32 0.008332161, %v445_v32  ;;  %v1261_v42 = vadd.f32 -0.0013887316, %v620_v33  ;;  %v83_v27 = vpop.permute.xlu0 %82 }
  0xb6   :  { %1166 = vst [vmem:[#allocation2 + $0x10] sm:$0xff] %v1016_v38  ;;  %1191 = vst [vmem:[#allocation2 + $0x18] sm:$0xff] %v1141_v40  ;;  %v1646_v43 = vsub.f32 %v319_v35, %v344_v36  ;;  %v720_v50 = vmul.f32 %v420_v21, %v420_v21  ;;  %v844_v52 = vand.u32 1, %v1320_v37  ;;  %v770_v54 = vmul.f32 0.5, %v420_v21 }
  0xb7   :  { %v495_v44 = vmul.f32 %v470_v41, %v420_v21  ;;  %v670_v45 = vmul.f32 %v1261_v42, %v420_v21  ;;  %v1044_v57 = vadd.s32 1, %v1320_v37  ;;  %vm1654_vm13 = vcmp.eq.s32.totalorder %v945_v46, 2 }
  0xb8   :  { %v419_v47 = vmul.f32 %v1646_v43, %v1646_v43  ;;  %vm1658_vm14 = vcmp.eq.s32.totalorder %v1070_v9, 2  ;;  %v272_v62 = vsub.f32 %v1621_v3, %v247_v48  ;;  %v297_v63 = vmul.f32 0.0004837513, %v1288_v24 }
  0xb9   :  { %v1236_v49 = vadd.f32 -0.16666655, %v495_v44  ;;  %v695_v51 = vadd.f32 0.041666646, %v670_v45  ;;  %v944_v13 = vand.u32 2, %v1320_v37  ;;  %v1664_v4 = vmul.f32 %v1502_v31, %v73_v53 }
  0xba   :  { %v444_v55 = vmul.f32 -0.00019515296, %v419_v47  ;;  %v619_v56 = vmul.f32 2.4433157e-05, %v419_v47  ;;  %v322_v8 = vsub.f32 %v272_v62, %v297_v63  ;;  %v347_v10 = vmul.f32 7.54979e-08, %v1288_v24 }
  0xbb   :  { %v545_v58 = vmul.f32 %v1236_v49, %v420_v21  ;;  %v745_v60 = vmul.f32 %v720_v50, %v695_v51  ;;  %v1069_v15 = vand.u32 2, %v1044_v57  ;;  %v1667_v16 = vcvt.f32.s32 %v197_v23 }
  0xbc   :  { %v469_v1 = vadd.f32 0.008332161, %v444_v55  ;;  %v1260_v2 = vadd.f32 -0.0013887316, %v619_v56  ;;  %vm1670_vm15 = vcmp.eq.s32.totalorder %v844_v52, 1  ;;  %v1674_v59 = vsub.f32 %v322_v8, %v347_v10 }
  0xbd   :  { %v570_v6 = vmul.f32 %v545_v58, %v1628_v18  ;;  %v795_v7 = vsub.f32 %v745_v60, %v770_v54  ;;  %v1677_v0 = vmul.f32 %v1502_v31, %v88_v5  ;;  %v719_v22 = vmul.f32 %v419_v47, %v419_v47 }
  0xbe   :  { %v494_v14 = vmul.f32 %v469_v1, %v419_v47  ;;  %v669_v17 = vmul.f32 %v1260_v2, %v419_v47  ;;  %v769_v26 = vmul.f32 0.5, %v419_v47  ;;  %v422_v28 = vmul.f32 %v1674_v59, %v1674_v59 }
  0xbf   :  { %v595_v3 = vadd.f32 %v570_v6, %v1628_v18  ;;  %v820_v12 = vadd.f32 1.0, %v795_v7  ;;  %v196_v11 = vmul.f32 0.63661975, %v1664_v4  ;;  %vm1686_vm0 = vcmp.eq.s32.totalorder %v944_v13, 2 }
  0xc0   :  { %v1235_v20 = vadd.f32 -0.16666655, %v494_v14  ;;  %v694_v21 = vadd.f32 0.041666646, %v669_v17  ;;  %vm1690_vm1 = vcmp.eq.s32.totalorder %v1069_v15, 2  ;;  %v1695_v38 = vmul.f32 %v1502_v31, %v83_v27 }
  0xc1   :  { %v895_v23 = vsel %vm1648_vm12, %v820_v12, %v595_v3  ;;  %v920_v18 = vsel %vm1648_vm12, %v595_v3, %v820_v12  ;;  %v447_v36 = vmul.f32 -0.00019515296, %v422_v28  ;;  %v622_v37 = vmul.f32 2.4433157e-05, %v422_v28 }
  0xc2   :  { %v995_v29 = vsub.f32 0.0, %v895_v23  ;;  %v1120_v30 = vsub.f32 0.0, %v920_v18  ;;  %v544_v32 = vmul.f32 %v1235_v20, %v419_v47  ;;  %v744_v33 = vmul.f32 %v719_v22, %v694_v21 }
  0xc3   :  { %v472_v44 = vadd.f32 0.008332161, %v447_v36  ;;  %v1263_v45 = vadd.f32 -0.0013887316, %v622_v37  ;;  %v847_v46 = vand.u32 1, %v1667_v16  ;;  %v1287_v9 = vround.rtne.f32 %v196_v11 }
  0xc4   :  { %v1020_v40 = vsel %vm1654_vm13, %v995_v29, %v895_v23  ;;  %v1145_v41 = vsel %vm1658_vm14, %v1120_v30, %v920_v18  ;;  %v569_v42 = vmul.f32 %v544_v32, %v1646_v43  ;;  %v794_v24 = vsub.f32 %v744_v33, %v769_v26 }
  0xc5   :  { %1170 = vst [vmem:[#allocation2 + $0x50] sm:$0xff] %v1020_v40  ;;  %1195 = vst [vmem:[#allocation2 + $0x58] sm:$0xff] %v1145_v41  ;;  %v947_v48 = vand.u32 2, %v1667_v16  ;;  %v1047_v49 = vadd.s32 1, %v1667_v16  ;;  %v497_v51 = vmul.f32 %v472_v44, %v422_v28  ;;  %v672_v50 = vmul.f32 %v1263_v45, %v422_v28 }
  0xc6   :  { %v594_v25 = vadd.f32 %v569_v42, %v1646_v43  ;;  %v819_v47 = vadd.f32 1.0, %v794_v24  ;;  %v722_v52 = vmul.f32 %v422_v28, %v422_v28  ;;  %v246_v53 = vmul.f32 1.5703125, %v1287_v9 }
  0xc7   :  { %v199_v56 = vmul.f32 0.63661975, %v1677_v0  ;;  %v1712_v57 = vmul.f32 0.63661975, %v1695_v38  ;;  %v1238_v60 = vadd.f32 -0.16666655, %v497_v51  ;;  %v1326_v10 = vcvt.f32.s32 %v196_v11 }
  0xc8   :  { %v894_v54 = vsel %vm1670_vm15, %v819_v47, %v594_v25  ;;  %v919_v55 = vsel %vm1670_vm15, %v594_v25, %v819_v47  ;;  %v697_v39 = vadd.f32 0.041666646, %v672_v50  ;;  %v772_v61 = vmul.f32 0.5, %v422_v28  ;;  %v98_v47 = vpop.permute.xlu1 %97 }
  0xc9   :  { %v994_v43 = vsub.f32 0.0, %v894_v54  ;;  %v1119_v58 = vsub.f32 0.0, %v919_v55  ;;  %v1072_v62 = vand.u32 2, %v1047_v49  ;;  %v271_v63 = vsub.f32 %v1664_v4, %v246_v53 }
  0xca   :  { %v296_v1 = vmul.f32 0.0004837513, %v1287_v9  ;;  %v547_v5 = vmul.f32 %v1238_v60, %v422_v28  ;;  %v747_v6 = vmul.f32 %v722_v52, %v697_v39  ;;  %v346_v8 = vmul.f32 7.54979e-08, %v1287_v9 }
  0xcb   :  { %v1019_v2 = vsel %vm1686_vm0, %v994_v43, %v894_v54  ;;  %v1144_v13 = vsel %vm1690_vm1, %v1119_v58, %v919_v55  ;;  %v1290_v14 = vround.rtne.f32 %v199_v56  ;;  %v1289_v4 = vround.rtne.f32 %v1712_v57 }
  0xcc   :  { %1169 = vst [vmem:[#allocation2 + $0x40] sm:$0xff] %v1019_v2  ;;  %1194 = vst [vmem:[#allocation2 + $0x48] sm:$0xff] %v1144_v13  ;;  %v321_v7 = vsub.f32 %v271_v63, %v296_v1  ;;  %v572_v17 = vmul.f32 %v547_v5, %v1674_v59  ;;  %v797_v15 = vsub.f32 %v747_v6, %v772_v61  ;;  %vm872_vm2 = vcmp.eq.s32.totalorder %v847_v46, 1 }
  0xcd   :  { %v249_v3 = vmul.f32 1.5703125, %v1290_v14  ;;  %vm1724_vm3 = vcmp.eq.s32.totalorder %v947_v48, 2  ;;  %vm1728_vm4 = vcmp.eq.s32.totalorder %v1072_v62, 2  ;;  %v1046_v26 = vadd.s32 1, %v1326_v10 }
  0xce   :  { %v1721_v16 = vsub.f32 %v321_v7, %v346_v8  ;;  %v597_v12 = vadd.f32 %v572_v17, %v1674_v59  ;;  %v822_v19 = vadd.f32 1.0, %v797_v15  ;;  %v299_v28 = vmul.f32 0.0004837513, %v1290_v14 }
  0xcf   :  { %v274_v27 = vsub.f32 %v1677_v0, %v249_v3  ;;  %v248_v59 = vmul.f32 1.5703125, %v1289_v4  ;;  %v846_v33 = vand.u32 1, %v1326_v10  ;;  %v349_v35 = vmul.f32 7.54979e-08, %v1290_v14 }
  0xd0   :  { %v421_v22 = vmul.f32 %v1721_v16, %v1721_v16  ;;  %v897_v23 = vsel %vm872_vm2, %v822_v19, %v597_v12  ;;  %v922_v18 = vsel %vm872_vm2, %v597_v12, %v822_v19  ;;  %v1735_v36 = vcvt.f32.s32 %v199_v56 }
  0xd1   :  { %v997_v11 = vsub.f32 0.0, %v897_v23  ;;  %v1122_v29 = vsub.f32 0.0, %v922_v18  ;;  %v324_v34 = vsub.f32 %v274_v27, %v299_v28  ;;  %v273_v24 = vsub.f32 %v1695_v38, %v248_v59 }
  0xd2   :  { %v446_v30 = vmul.f32 -0.00019515296, %v421_v22  ;;  %v621_v32 = vmul.f32 2.4433157e-05, %v421_v22  ;;  %v298_v44 = vmul.f32 0.0004837513, %v1289_v4  ;;  %v946_v9 = vand.u32 2, %v1326_v10 }
  0xd3   :  { %v1022_v37 = vsel %vm1724_vm3, %v997_v11, %v897_v23  ;;  %v1147_v40 = vsel %vm1728_vm4, %v1122_v29, %v922_v18  ;;  %v1741_v42 = vsub.f32 %v324_v34, %v349_v35  ;;  %v1071_v25 = vand.u32 2, %v1046_v26  ;;  %v93_v18 = vpop.permute.xlu0 %92 }
  0xd4   :  { %v471_v0 = vadd.f32 0.008332161, %v446_v30  ;;  %v1262_v41 = vadd.f32 -0.0013887316, %v621_v32  ;;  %1172 = vst [vmem:[#allocation2 + $0x70] sm:$0xff] %v1022_v37  ;;  %1197 = vst [vmem:[#allocation2 + $0x78] sm:$0xff] %v1147_v40  ;;  %v323_v52 = vsub.f32 %v273_v24, %v298_v44  ;;  %v721_v54 = vmul.f32 %v421_v22, %v421_v22 }
  0xd5   :  { %vm1744_vm5 = vcmp.eq.s32.totalorder %v846_v33, 1  ;;  %v424_v49 = vmul.f32 %v1741_v42, %v1741_v42  ;;  %v849_v51 = vand.u32 1, %v1735_v36  ;;  %v1049_v50 = vadd.s32 1, %v1735_v36 }
  0xd6   :  { %v496_v45 = vmul.f32 %v471_v0, %v421_v22  ;;  %v671_v46 = vmul.f32 %v1262_v41, %v421_v22  ;;  %v348_v55 = vmul.f32 7.54979e-08, %v1289_v4  ;;  %v1753_v58 = vcvt.f32.s32 %v1712_v57 }
  0xd7   :  { %v449_v56 = vmul.f32 -0.00019515296, %v424_v49  ;;  %v624_v43 = vmul.f32 2.4433157e-05, %v424_v49  ;;  %v1756_v60 = vmul.f32 %v1502_v31, %v98_v47  ;;  %v771_v62 = vmul.f32 0.5, %v421_v22 }
  0xd8   :  { %v1237_v53 = vadd.f32 -0.16666655, %v496_v45  ;;  %v696_v38 = vadd.f32 0.041666646, %v671_v46  ;;  %vm1758_vm6 = vcmp.eq.s32.totalorder %v946_v9, 2  ;;  %v1762_v1 = vsub.f32 %v323_v52, %v348_v55 }
  0xd9   :  { %vm1764_vm7 = vcmp.eq.s32.totalorder %v1071_v25, 2  ;;  %v474_v13 = vadd.f32 0.008332161, %v449_v56  ;;  %v1265_v5 = vadd.f32 -0.0013887316, %v624_v43  ;;  %v949_v57 = vand.u32 2, %v1735_v36 }
  0xda   :  { %v546_v39 = vmul.f32 %v1237_v53, %v421_v22  ;;  %v746_v61 = vmul.f32 %v721_v54, %v696_v38  ;;  %v1074_v8 = vand.u32 2, %v1049_v50  ;;  %v423_v10 = vmul.f32 %v1762_v1, %v1762_v1 }
  0xdb   :  { %v499_v14 = vmul.f32 %v474_v13, %v424_v49  ;;  %v674_v17 = vmul.f32 %v1265_v5, %v424_v49  ;;  %v848_v15 = vand.u32 1, %v1753_v58  ;;  %v201_v4 = vmul.f32 0.63661975, %v1756_v60 }
  0xdc   :  { %v571_v6 = vmul.f32 %v546_v39, %v1721_v16  ;;  %v796_v7 = vsub.f32 %v746_v61, %v771_v62  ;;  %vm1775_vm8 = vcmp.eq.s32.totalorder %v849_v51, 1  ;;  %v448_v20 = vmul.f32 -0.00019515296, %v423_v10 }
  0xdd   :  { %v623_v21 = vmul.f32 2.4433157e-05, %v423_v10  ;;  %v1240_v22 = vadd.f32 -0.16666655, %v499_v14  ;;  %v699_v26 = vadd.f32 0.041666646, %v674_v17  ;;  %v724_v27 = vmul.f32 %v424_v49, %v424_v49  ;;  %v108_v14 = vpop.permute.xlu1 %107  ;;  %v103_v17 = vpop.permute.xlu0 %102 }
  0xde   :  { %v596_v3 = vadd.f32 %v571_v6, %v1721_v16  ;;  %v821_v12 = vadd.f32 1.0, %v796_v7  ;;  %v774_v23 = vmul.f32 0.5, %v424_v49  ;;  %v473_v11 = vadd.f32 0.008332161, %v448_v20 }
  0xdf   :  { %v1264_v16 = vadd.f32 -0.0013887316, %v623_v21  ;;  %v549_v32 = vmul.f32 %v1240_v22, %v424_v49  ;;  %v749_v33 = vmul.f32 %v724_v27, %v699_v26  ;;  %vm1783_vm9 = vcmp.eq.s32.totalorder %v949_v57, 2 }
  0xe0   :  { %v896_v28 = vsel %vm1744_vm5, %v821_v12, %v596_v3  ;;  %v921_v59 = vsel %vm1744_vm5, %v596_v3, %v821_v12  ;;  %vm1787_vm10 = vcmp.eq.s32.totalorder %v1074_v8, 2  ;;  %v498_v36 = vmul.f32 %v473_v11, %v423_v10 }
  0xe1   :  { %v996_v29 = vsub.f32 0.0, %v896_v28  ;;  %v1121_v30 = vsub.f32 0.0, %v921_v59  ;;  %v673_v37 = vmul.f32 %v1264_v16, %v423_v10  ;;  %v1292_v40 = vround.rtne.f32 %v201_v4 }
  0xe2   :  { %v1792_v0 = vmul.f32 %v1502_v31, %v93_v18  ;;  %v574_v44 = vmul.f32 %v549_v32, %v1741_v42  ;;  %v799_v45 = vsub.f32 %v749_v33, %v774_v23  ;;  %v1239_v46 = vadd.f32 -0.16666655, %v498_v36 }
  0xe3   :  { %v1021_v41 = vsel %vm1758_vm6, %v996_v29, %v896_v28  ;;  %v1146_v24 = vsel %vm1764_vm7, %v1121_v30, %v921_v59  ;;  %v698_v9 = vadd.f32 0.041666646, %v673_v37  ;;  %v723_v25 = vmul.f32 %v423_v10, %v423_v10 }
  0xe4   :  { %1171 = vst [vmem:[#allocation2 + $0x60] sm:$0xff] %v1021_v41  ;;  %1196 = vst [vmem:[#allocation2 + $0x68] sm:$0xff] %v1146_v24  ;;  %v251_v47 = vmul.f32 1.5703125, %v1292_v40  ;;  %v599_v48 = vadd.f32 %v574_v44, %v1741_v42  ;;  %v824_v49 = vadd.f32 1.0, %v799_v45  ;;  %v948_v51 = vand.u32 2, %v1753_v58 }
  0xe5   :  { %v1048_v50 = vadd.s32 1, %v1753_v58  ;;  %v548_v52 = vmul.f32 %v1239_v46, %v423_v10  ;;  %v748_v53 = vmul.f32 %v723_v25, %v698_v9  ;;  %v773_v38 = vmul.f32 0.5, %v423_v10 }
  0xe6   :  { %v276_v54 = vsub.f32 %v1756_v60, %v251_v47  ;;  %v899_v55 = vsel %vm1775_vm8, %v824_v49, %v599_v48  ;;  %v924_v56 = vsel %vm1775_vm8, %v599_v48, %v824_v49  ;;  %v301_v43 = vmul.f32 0.0004837513, %v1292_v40  ;;  %v118_v47 = vpop.permute.xlu1 %117 }
  0xe7   :  { %v200_v39 = vmul.f32 0.63661975, %v1792_v0  ;;  %v999_v42 = vsub.f32 0.0, %v899_v55  ;;  %v1124_v61 = vsub.f32 0.0, %v924_v56  ;;  %v573_v62 = vmul.f32 %v548_v52, %v1762_v1 }
  0xe8   :  { %v798_v63 = vsub.f32 %v748_v53, %v773_v38  ;;  %v1073_v58 = vand.u32 2, %v1048_v50  ;;  %v326_v2 = vsub.f32 %v276_v54, %v301_v43  ;;  %v351_v13 = vmul.f32 7.54979e-08, %v1292_v40 }
  0xe9   :  { %v1341_v5 = vcvt.f32.s32 %v201_v4  ;;  %v1024_v60 = vsel %vm1783_vm9, %v999_v42, %v899_v55  ;;  %v1149_v57 = vsel %vm1787_vm10, %v1124_v61, %v924_v56  ;;  %v598_v6 = vadd.f32 %v573_v62, %v1762_v1 }
  0xea   :  { %v823_v7 = vadd.f32 1.0, %v798_v63  ;;  %1174 = vst [vmem:[#allocation2 + $0x90] sm:$0xff] %v1024_v60  ;;  %1199 = vst [vmem:[#allocation2 + $0x98] sm:$0xff] %v1149_v57  ;;  %vm873_vm11 = vcmp.eq.s32.totalorder %v848_v15, 1  ;;  %v1814_v8 = vsub.f32 %v326_v2, %v351_v13  ;;  %v1291_v10 = vround.rtne.f32 %v200_v39 }
  0xeb   :  { %vm973_vm12 = vcmp.eq.s32.totalorder %v948_v51, 2  ;;  %vm1098_vm13 = vcmp.eq.s32.totalorder %v1073_v58, 2  ;;  %v1051_v21 = vadd.s32 1, %v1341_v5  ;;  %v178_v22 = vmul.f32 %v1502_v31, %v108_v14 }
  0xec   :  { %v898_v3 = vsel %vm873_vm11, %v823_v7, %v598_v6  ;;  %v923_v12 = vsel %vm873_vm11, %v598_v6, %v823_v7  ;;  %v426_v20 = vmul.f32 %v1814_v8, %v1814_v8  ;;  %v250_v1 = vmul.f32 1.5703125, %v1291_v10 }
  0xed   :  { %v998_v4 = vsub.f32 0.0, %v898_v3  ;;  %v1123_v19 = vsub.f32 0.0, %v923_v12  ;;  %v1820_v15 = vmul.f32 %v1502_v31, %v103_v17  ;;  %v300_v59 = vmul.f32 0.0004837513, %v1291_v10 }
  0xee   :  { %v451_v23 = vmul.f32 -0.00019515296, %v426_v20  ;;  %v626_v18 = vmul.f32 2.4433157e-05, %v426_v20  ;;  %v275_v28 = vsub.f32 %v1792_v0, %v250_v1  ;;  %v1823_v11 = vcvt.f32.s32 %v200_v39 }
  0xef   :  { %v1023_v26 = vsel %vm973_vm12, %v998_v4, %v898_v3  ;;  %v1148_v27 = vsel %vm1098_vm13, %v1123_v19, %v923_v12  ;;  %v851_v30 = vand.u32 1, %v1341_v5  ;;  %v951_v32 = vand.u32 2, %v1341_v5 }
  0xf0   :  { %1173 = vst [vmem:[#allocation2 + $0x80] sm:$0xff] %v1023_v26  ;;  %1198 = vst [vmem:[#allocation2 + $0x88] sm:$0xff] %v1148_v27  ;;  %v476_v16 = vadd.f32 0.008332161, %v451_v23  ;;  %v1267_v29 = vadd.f32 -0.0013887316, %v626_v18  ;;  %v325_v33 = vsub.f32 %v275_v28, %v300_v59  ;;  %v726_v9 = vmul.f32 %v426_v20, %v426_v20 }
  0xf1   :  { %v350_v34 = vmul.f32 7.54979e-08, %v1291_v10  ;;  %v203_v35 = vmul.f32 0.63661975, %v178_v22  ;;  %v1076_v40 = vand.u32 2, %v1051_v21  ;;  %v1050_v0 = vadd.s32 1, %v1823_v11 }
  0xf2   :  { %v501_v36 = vmul.f32 %v476_v16, %v426_v20  ;;  %v676_v37 = vmul.f32 %v1267_v29, %v426_v20  ;;  %v1826_v41 = vmul.f32 0.63661975, %v1820_v15  ;;  %vm1831_vm14 = vcmp.eq.s32.totalorder %v851_v30, 1 }
  0xf3   :  { %v1828_v24 = vsub.f32 %v325_v33, %v350_v34  ;;  %v1294_v44 = vround.rtne.f32 %v203_v35  ;;  %v776_v48 = vmul.f32 0.5, %v426_v20  ;;  %v850_v51 = vand.u32 1, %v1823_v11 }
  0xf4   :  { %v1242_v45 = vadd.f32 -0.16666655, %v501_v36  ;;  %v701_v46 = vadd.f32 0.041666646, %v676_v37  ;;  %vm1838_vm15 = vcmp.eq.s32.totalorder %v951_v32, 2  ;;  %vm1842_vm0 = vcmp.eq.s32.totalorder %v1076_v40, 2 }
  0xf5   :  { %v425_v49 = vmul.f32 %v1828_v24, %v1828_v24  ;;  %v253_v50 = vmul.f32 1.5703125, %v1294_v44  ;;  %v950_v55 = vand.u32 2, %v1823_v11  ;;  %v1293_v56 = vround.rtne.f32 %v1826_v41 }
  0xf6   :  { %v551_v52 = vmul.f32 %v1242_v45, %v426_v20  ;;  %v751_v53 = vmul.f32 %v726_v9, %v701_v46  ;;  %v1075_v42 = vand.u32 2, %v1050_v0  ;;  %v1849_v61 = vmul.f32 %v1502_v31, %v118_v47 }
  0xf7   :  { %v450_v43 = vmul.f32 -0.00019515296, %v425_v49  ;;  %v625_v39 = vmul.f32 2.4433157e-05, %v425_v49  ;;  %v278_v58 = vsub.f32 %v178_v22, %v253_v50  ;;  %v303_v2 = vmul.f32 0.0004837513, %v1294_v44 }
  0xf8   :  { %v576_v62 = vmul.f32 %v551_v52, %v1814_v8  ;;  %v801_v63 = vsub.f32 %v751_v53, %v776_v48  ;;  %v353_v60 = vmul.f32 7.54979e-08, %v1294_v44  ;;  %v1852_v57 = vcvt.f32.s32 %v203_v35 }
  0xf9   :  { %v475_v13 = vadd.f32 0.008332161, %v450_v43  ;;  %v1266_v5 = vadd.f32 -0.0013887316, %v625_v39  ;;  %v328_v10 = vsub.f32 %v278_v58, %v303_v2  ;;  %v252_v14 = vmul.f32 1.5703125, %v1293_v56  ;;  %v113_v2 = vpop.permute.xlu0 %112 }
  0xfa   :  { %v601_v6 = vadd.f32 %v576_v62, %v1814_v8  ;;  %v826_v7 = vadd.f32 1.0, %v801_v63  ;;  %v725_v12 = vmul.f32 %v425_v49, %v425_v49  ;;  %v302_v4 = vmul.f32 0.0004837513, %v1293_v56 }
  0xfb   :  { %v500_v17 = vmul.f32 %v475_v13, %v425_v49  ;;  %v675_v3 = vmul.f32 %v1266_v5, %v425_v49  ;;  %vm1859_vm1 = vcmp.eq.s32.totalorder %v850_v51, 1  ;;  %v1863_v1 = vsub.f32 %v328_v10, %v353_v60  ;;  %v128_v13 = vpop.permute.xlu1 %127 }
  0xfc   :  { %v901_v19 = vsel %vm1831_vm14, %v826_v7, %v601_v6  ;;  %v926_v20 = vsel %vm1831_vm14, %v601_v6, %v826_v7  ;;  %v277_v8 = vsub.f32 %v1820_v15, %v252_v14  ;;  %v775_v18 = vmul.f32 0.5, %v425_v49 }
  0xfd   :  { %v1001_v22 = vsub.f32 0.0, %v901_v19  ;;  %v1126_v26 = vsub.f32 0.0, %v926_v20  ;;  %v1241_v27 = vadd.f32 -0.16666655, %v500_v17  ;;  %v700_v23 = vadd.f32 0.041666646, %v675_v3 }
  0xfe   :  { %v428_v28 = vmul.f32 %v1863_v1, %v1863_v1  ;;  %v327_v59 = vsub.f32 %v277_v8, %v302_v4  ;;  %v352_v11 = vmul.f32 7.54979e-08, %v1293_v56  ;;  %vm1872_vm2 = vcmp.eq.s32.totalorder %v950_v55, 2 }
  0xff   :  { %v1026_v16 = vsel %vm1838_vm15, %v1001_v22, %v901_v19  ;;  %v1151_v29 = vsel %vm1842_vm0, %v1126_v26, %v926_v20  ;;  %v550_v30 = vmul.f32 %v1241_v27, %v425_v49  ;;  %v750_v32 = vmul.f32 %v725_v12, %v700_v23 }
 0x100   :  { %1176 = vst [vmem:[#allocation2 + $0xb0] sm:$0xff] %v1026_v16  ;;  %1201 = vst [vmem:[#allocation2 + $0xb8] sm:$0xff] %v1151_v29  ;;  %v453_v33 = vmul.f32 -0.00019515296, %v428_v28  ;;  %v628_v34 = vmul.f32 2.4433157e-05, %v428_v28  ;;  %v1882_v0 = vsub.f32 %v327_v59, %v352_v11  ;;  %v1886_v9 = vcvt.f32.s32 %v1826_v41 }
 0x101   :  { %v1053_v35 = vadd.s32 1, %v1852_v57  ;;  %v575_v36 = vmul.f32 %v550_v30, %v1828_v24  ;;  %v800_v37 = vsub.f32 %v750_v32, %v775_v18  ;;  %vm1878_vm3 = vcmp.eq.s32.totalorder %v1075_v42, 2 }
 0x102   :  { %v478_v44 = vadd.f32 0.008332161, %v453_v33  ;;  %v1269_v45 = vadd.f32 -0.0013887316, %v628_v34  ;;  %v853_v46 = vand.u32 1, %v1852_v57  ;;  %v953_v48 = vand.u32 2, %v1852_v57 }
 0x103   :  { %v600_v25 = vadd.f32 %v575_v36, %v1828_v24  ;;  %v825_v47 = vadd.f32 1.0, %v800_v37  ;;  %v427_v49 = vmul.f32 %v1882_v0, %v1882_v0  ;;  %v728_v52 = vmul.f32 %v428_v28, %v428_v28 }
 0x104   :  { %v503_v51 = vmul.f32 %v478_v44, %v428_v28  ;;  %v678_v50 = vmul.f32 %v1269_v45, %v428_v28  ;;  %v1078_v53 = vand.u32 2, %v1053_v35  ;;  %v778_v42 = vmul.f32 0.5, %v428_v28 }
 0x105   :  { %v900_v38 = vsel %vm1859_vm1, %v825_v47, %v600_v25  ;;  %v925_v54 = vsel %vm1859_vm1, %v600_v25, %v825_v47  ;;  %v452_v41 = vmul.f32 -0.00019515296, %v427_v49  ;;  %v627_v55 = vmul.f32 2.4433157e-05, %v427_v49 }
 0x106   :  { %v1000_v56 = vsub.f32 0.0, %v900_v38  ;;  %v1125_v24 = vsub.f32 0.0, %v925_v54  ;;  %v1244_v43 = vadd.f32 -0.16666655, %v503_v51  ;;  %v703_v39 = vadd.f32 0.041666646, %v678_v50 }
 0x107   :  { %vm1896_vm4 = vcmp.eq.s32.totalorder %v853_v46, 1  ;;  %v477_v63 = vadd.f32 0.008332161, %v452_v41  ;;  %v1268_v58 = vadd.f32 -0.0013887316, %v627_v55  ;;  %vm1904_vm5 = vcmp.eq.s32.totalorder %v953_v48, 2 }
 0x108   :  { %v1025_v5 = vsel %vm1872_vm2, %v1000_v56, %v900_v38  ;;  %v1150_v60 = vsel %vm1878_vm3, %v1125_v24, %v925_v54  ;;  %v553_v57 = vmul.f32 %v1244_v43, %v428_v28  ;;  %v753_v6 = vmul.f32 %v728_v52, %v703_v39 }
 0x109   :  { %1175 = vst [vmem:[#allocation2 + $0xa0] sm:$0xff] %v1025_v5  ;;  %1200 = vst [vmem:[#allocation2 + $0xa8] sm:$0xff] %v1150_v60  ;;  %vm1908_vm6 = vcmp.eq.s32.totalorder %v1078_v53, 2  ;;  %v502_v14 = vmul.f32 %v477_v63, %v427_v49  ;;  %v677_v17 = vmul.f32 %v1268_v58, %v427_v49  ;;  %v205_v3 = vmul.f32 0.63661975, %v1849_v61 }
 0x10a   :  { %v578_v12 = vmul.f32 %v553_v57, %v1863_v1  ;;  %v803_v4 = vsub.f32 %v753_v6, %v778_v42  ;;  %v179_v19 = vmul.f32 %v1502_v31, %v113_v2  ;;  %v1916_v20 = vmul.f32 %v1502_v31, %v128_v13  ;;  %v123_v13 = vpop.permute.xlu0 %122 }
 0x10b   :  { %v1243_v21 = vadd.f32 -0.16666655, %v502_v14  ;;  %v702_v8 = vadd.f32 0.041666646, %v677_v17  ;;  %v727_v22 = vmul.f32 %v427_v49, %v427_v49  ;;  %v1296_v26 = vround.rtne.f32 %v205_v3 }
 0x10c   :  { %v603_v27 = vadd.f32 %v578_v12, %v1863_v1  ;;  %v828_v23 = vadd.f32 1.0, %v803_v4  ;;  %v852_v18 = vand.u32 1, %v1886_v9  ;;  %v1052_v28 = vadd.s32 1, %v1886_v9 }
 0x10d   :  { %v552_v59 = vmul.f32 %v1243_v21, %v427_v49  ;;  %v752_v11 = vmul.f32 %v727_v22, %v702_v8  ;;  %v777_v16 = vmul.f32 0.5, %v427_v49  ;;  %v255_v29 = vmul.f32 1.5703125, %v1296_v26 }
 0x10e   :  { %v903_v30 = vsel %vm1896_vm4, %v828_v23, %v603_v27  ;;  %v928_v32 = vsel %vm1896_vm4, %v603_v27, %v828_v23  ;;  %v204_v15 = vmul.f32 0.63661975, %v179_v19  ;;  %v207_v33 = vmul.f32 0.63661975, %v1916_v20 }
 0x10f   :  { %v1003_v34 = vsub.f32 0.0, %v903_v30  ;;  %v1128_v1 = vsub.f32 0.0, %v928_v32  ;;  %v577_v35 = vmul.f32 %v552_v59, %v1882_v0  ;;  %v802_v36 = vsub.f32 %v752_v11, %v777_v16 }
 0x110   :  { %v952_v37 = vand.u32 2, %v1886_v9  ;;  %v1077_v40 = vand.u32 2, %v1052_v28  ;;  %v280_v44 = vsub.f32 %v1849_v61, %v255_v29  ;;  %v305_v45 = vmul.f32 0.0004837513, %v1296_v26 }
 0x111   :  { %v1028_v46 = vsel %vm1904_vm5, %v1003_v34, %v903_v30  ;;  %v1153_v25 = vsel %vm1908_vm6, %v1128_v1, %v928_v32  ;;  %v602_v47 = vadd.f32 %v577_v35, %v1882_v0  ;;  %v827_v48 = vadd.f32 1.0, %v802_v36 }
 0x112   :  { %1178 = vst [vmem:[#allocation2 + $0xd0] sm:$0xff] %v1028_v46  ;;  %1203 = vst [vmem:[#allocation2 + $0xd8] sm:$0xff] %v1153_v25  ;;  %vm877_vm7 = vcmp.eq.s32.totalorder %v852_v18, 1  ;;  %v330_v49 = vsub.f32 %v280_v44, %v305_v45  ;;  %v355_v51 = vmul.f32 7.54979e-08, %v1296_v26  ;;  %v1295_v50 = vround.rtne.f32 %v204_v15 }
 0x113   :  { %v902_v9 = vsel %vm877_vm7, %v827_v48, %v602_v47  ;;  %v927_v52 = vsel %vm877_vm7, %v602_v47, %v827_v48  ;;  %v1353_v53 = vcvt.f32.s32 %v205_v3  ;;  %v1298_v61 = vround.rtne.f32 %v207_v33 }
 0x114   :  { %v1002_v38 = vsub.f32 0.0, %v902_v9  ;;  %v1127_v54 = vsub.f32 0.0, %v927_v52  ;;  %v1934_v41 = vsub.f32 %v330_v49, %v355_v51  ;;  %vm977_vm8 = vcmp.eq.s32.totalorder %v952_v37, 2 }
 0x115   :  { %vm1102_vm9 = vcmp.eq.s32.totalorder %v1077_v40, 2  ;;  %v254_v55 = vmul.f32 1.5703125, %v1295_v50  ;;  %v1055_v43 = vadd.s32 1, %v1353_v53  ;;  %v304_v42 = vmul.f32 0.0004837513, %v1295_v50 }
 0x116   :  { %v1027_v56 = vsel %vm977_vm8, %v1002_v38, %v902_v9  ;;  %v1152_v0 = vsel %vm1102_vm9, %v1127_v54, %v927_v52  ;;  %v430_v24 = vmul.f32 %v1934_v41, %v1934_v41  ;;  %v257_v62 = vmul.f32 1.5703125, %v1298_v61 }
 0x117   :  { %1177 = vst [vmem:[#allocation2 + $0xc0] sm:$0xff] %v1027_v56  ;;  %1202 = vst [vmem:[#allocation2 + $0xc8] sm:$0xff] %v1152_v0  ;;  %v279_v39 = vsub.f32 %v179_v19, %v254_v55  ;;  %v855_v2 = vand.u32 1, %v1353_v53  ;;  %v354_v60 = vmul.f32 7.54979e-08, %v1295_v50  ;;  %v1350_v57 = vcvt.f32.s32 %v204_v15 }
 0x118   :  { %v455_v63 = vmul.f32 -0.00019515296, %v430_v24  ;;  %v630_v58 = vmul.f32 2.4433157e-05, %v430_v24  ;;  %v282_v6 = vsub.f32 %v1916_v20, %v257_v62  ;;  %v955_v14 = vand.u32 2, %v1353_v53 }
 0x119   :  { %v329_v5 = vsub.f32 %v279_v39, %v304_v42  ;;  %v307_v17 = vmul.f32 0.0004837513, %v1298_v61  ;;  %v1080_v3 = vand.u32 2, %v1055_v43  ;;  %v1941_v4 = vcvt.f32.s32 %v207_v33 }
 0x11a   :  { %v480_v7 = vadd.f32 0.008332161, %v455_v63  ;;  %v1271_v10 = vadd.f32 -0.0013887316, %v630_v58  ;;  %v1944_v19 = vmul.f32 %v1502_v31, %v123_v13  ;;  %v357_v26 = vmul.f32 7.54979e-08, %v1298_v61 }
 0x11b   :  { %v1939_v12 = vsub.f32 %v329_v5, %v354_v60  ;;  %v332_v22 = vsub.f32 %v282_v6, %v307_v17  ;;  %vm1946_vm10 = vcmp.eq.s32.totalorder %v855_v2, 1  ;;  %v854_v23 = vand.u32 1, %v1350_v57 }
 0x11c   :  { %v505_v21 = vmul.f32 %v480_v7, %v430_v24  ;;  %v680_v8 = vmul.f32 %v1271_v10, %v430_v24  ;;  %v954_v18 = vand.u32 2, %v1350_v57  ;;  %v1953_v28 = vmul.f32 0.63661975, %v1944_v19 }
 0x11d   :  { %v429_v20 = vmul.f32 %v1939_v12, %v1939_v12  ;;  %v730_v16 = vmul.f32 %v430_v24, %v430_v24  ;;  %v1955_v29 = vsub.f32 %v332_v22, %v357_v26  ;;  %v780_v30 = vmul.f32 0.5, %v430_v24 }
 0x11e   :  { %v1246_v59 = vadd.f32 -0.16666655, %v505_v21  ;;  %v705_v11 = vadd.f32 0.041666646, %v680_v8  ;;  %v1957_v33 = vadd.s32 1, %v1350_v57  ;;  %vm1959_vm11 = vcmp.eq.s32.totalorder %v955_v14, 2 }
 0x11f   :  { %v454_v32 = vmul.f32 -0.00019515296, %v429_v20  ;;  %v629_v15 = vmul.f32 2.4433157e-05, %v429_v20  ;;  %vm1963_vm12 = vcmp.eq.s32.totalorder %v1080_v3, 2  ;;  %v432_v37 = vmul.f32 %v1955_v29, %v1955_v29 }
 0x120   :  { %v555_v34 = vmul.f32 %v1246_v59, %v430_v24  ;;  %v755_v1 = vmul.f32 %v730_v16, %v705_v11  ;;  %v1970_v40 = vadd.s32 1, %v1941_v4  ;;  %v729_v46 = vmul.f32 %v429_v20, %v429_v20 }
 0x121   :  { %v479_v44 = vadd.f32 0.008332161, %v454_v32  ;;  %v1270_v45 = vadd.f32 -0.0013887316, %v629_v15  ;;  %v1297_v25 = vround.rtne.f32 %v1953_v28  ;;  %v457_v49 = vmul.f32 -0.00019515296, %v432_v37  ;;  %v133_v15 = vpop.permute.xlu0 %132 }
 0x122   :  { %v580_v47 = vmul.f32 %v555_v34, %v1934_v41  ;;  %v805_v48 = vsub.f32 %v755_v1, %v780_v30  ;;  %v632_v51 = vmul.f32 2.4433157e-05, %v432_v37  ;;  %v779_v52 = vmul.f32 0.5, %v429_v20 }
 0x123   :  { %v504_v50 = vmul.f32 %v479_v44, %v429_v20  ;;  %v679_v9 = vmul.f32 %v1270_v45, %v429_v20  ;;  %v732_v53 = vmul.f32 %v432_v37, %v432_v37  ;;  %vm1975_vm13 = vcmp.eq.s32.totalorder %v854_v23, 1 }
 0x124   :  { %v605_v61 = vadd.f32 %v580_v47, %v1934_v41  ;;  %v830_v38 = vadd.f32 1.0, %v805_v48  ;;  %v482_v55 = vadd.f32 0.008332161, %v457_v49  ;;  %v1273_v56 = vadd.f32 -0.0013887316, %v632_v51 }
 0x125   :  { %v1245_v0 = vadd.f32 -0.16666655, %v504_v50  ;;  %v704_v24 = vadd.f32 0.041666646, %v679_v9  ;;  %v782_v43 = vmul.f32 0.5, %v432_v37  ;;  %v256_v39 = vmul.f32 1.5703125, %v1297_v25 }
 0x126   :  { %v905_v42 = vsel %vm1946_vm10, %v830_v38, %v605_v61  ;;  %v930_v62 = vsel %vm1946_vm10, %v605_v61, %v830_v38  ;;  %v507_v63 = vmul.f32 %v482_v55, %v432_v37  ;;  %v682_v58 = vmul.f32 %v1273_v56, %v432_v37 }
 0x127   :  { %v1005_v41 = vsub.f32 0.0, %v905_v42  ;;  %v1130_v2 = vsub.f32 0.0, %v930_v62  ;;  %v554_v13 = vmul.f32 %v1245_v0, %v429_v20  ;;  %v754_v5 = vmul.f32 %v729_v46, %v704_v24  ;;  %v138_v20 = vpop.permute.xlu1 %137 }
 0x128   :  { %vm1983_vm14 = vcmp.eq.s32.totalorder %v954_v18, 2  ;;  %v1248_v57 = vadd.f32 -0.16666655, %v507_v63  ;;  %v707_v6 = vadd.f32 0.041666646, %v682_v58  ;;  %v281_v7 = vsub.f32 %v1944_v19, %v256_v39 }
 0x129   :  { %v306_v10 = vmul.f32 0.0004837513, %v1297_v25  ;;  %v1030_v14 = vsel %vm1959_vm11, %v1005_v41, %v905_v42  ;;  %v1155_v17 = vsel %vm1963_vm12, %v1130_v2, %v930_v62  ;;  %v579_v3 = vmul.f32 %v554_v13, %v1939_v12 }
 0x12a   :  { %v804_v21 = vsub.f32 %v754_v5, %v779_v52  ;;  %1180 = vst [vmem:[#allocation2 + $0xf0] sm:$0xff] %v1030_v14  ;;  %1205 = vst [vmem:[#allocation2 + $0xf8] sm:$0xff] %v1155_v17  ;;  %v557_v8 = vmul.f32 %v1248_v57, %v432_v37  ;;  %v757_v22 = vmul.f32 %v732_v53, %v707_v6  ;;  %v356_v27 = vmul.f32 7.54979e-08, %v1297_v25 }
 0x12b   :  { %v331_v26 = vsub.f32 %v281_v7, %v306_v10  ;;  %v604_v23 = vadd.f32 %v579_v3, %v1939_v12  ;;  %v1079_v18 = vand.u32 2, %v1957_v33  ;;  %v857_v59 = vand.u32 1, %v1941_v4  ;;  %v148_v39 = vpop.permute.xlu1 %147 }
 0x12c   :  { %v829_v19 = vadd.f32 1.0, %v804_v21  ;;  %v582_v11 = vmul.f32 %v557_v8, %v1955_v29  ;;  %v807_v16 = vsub.f32 %v757_v22, %v782_v43  ;;  %v957_v30 = vand.u32 2, %v1941_v4 }
 0x12d   :  { %v1998_v32 = vsub.f32 %v331_v26, %v356_v27  ;;  %v1082_v12 = vand.u32 2, %v1970_v40  ;;  %v184_v33 = vmul.f32 %v1502_v31, %v138_v20  ;;  %vm1104_vm15 = vcmp.eq.s32.totalorder %v1079_v18, 2 }
 0x12e   :  { %v904_v34 = vsel %vm1975_vm13, %v829_v19, %v604_v23  ;;  %v929_v1 = vsel %vm1975_vm13, %v604_v23, %v829_v19  ;;  %v607_v37 = vadd.f32 %v582_v11, %v1955_v29  ;;  %v832_v44 = vadd.f32 1.0, %v807_v16 }
 0x12f   :  { %v1004_v35 = vsub.f32 0.0, %v904_v34  ;;  %v1129_v36 = vsub.f32 0.0, %v929_v1  ;;  %vm882_vm0 = vcmp.eq.s32.totalorder %v857_v59, 1  ;;  %v431_v4 = vmul.f32 %v1998_v32, %v1998_v32 }
 0x130   :  { %v183_v45 = vmul.f32 %v1502_v31, %v133_v15  ;;  %v907_v47 = vsel %vm882_vm0, %v832_v44, %v607_v37  ;;  %v932_v40 = vsel %vm882_vm0, %v607_v37, %v832_v44  ;;  %vm982_vm1 = vcmp.eq.s32.totalorder %v957_v30, 2  ;;  %v143_v15 = vpop.permute.xlu0 %142 }
 0x131   :  { %v1029_v46 = vsel %vm1983_vm14, %v1004_v35, %v904_v34  ;;  %v1154_v25 = vsel %vm1104_vm15, %v1129_v36, %v929_v1  ;;  %v1007_v48 = vsub.f32 0.0, %v907_v47  ;;  %v1132_v49 = vsub.f32 0.0, %v932_v40 }
 0x132   :  { %1179 = vst [vmem:[#allocation2 + $0xe0] sm:$0xff] %v1029_v46  ;;  %1204 = vst [vmem:[#allocation2 + $0xe8] sm:$0xff] %v1154_v25  ;;  %v456_v51 = vmul.f32 -0.00019515296, %v431_v4  ;;  %v631_v29 = vmul.f32 2.4433157e-05, %v431_v4  ;;  %v1356_v50 = vcvt.f32.s32 %v1953_v28  ;;  %v731_v63 = vmul.f32 %v431_v4, %v431_v4 }
 0x133   :  { %vm1107_vm2 = vcmp.eq.s32.totalorder %v1082_v12, 2  ;;  %v209_v9 = vmul.f32 0.63661975, %v184_v33  ;;  %v1032_v52 = vsel %vm982_vm1, %v1007_v48, %v907_v47  ;;  %v208_v55 = vmul.f32 0.63661975, %v183_v45 }
 0x134   :  { %v1157_v53 = vsel %vm1107_vm2, %v1132_v49, %v932_v40  ;;  %v481_v61 = vadd.f32 0.008332161, %v456_v51  ;;  %v1272_v38 = vadd.f32 -0.0013887316, %v631_v29  ;;  %1182 = vst [vmem:[#allocation2 + $0x110] sm:$0xff] %v1032_v52  ;;  %v856_v24 = vand.u32 1, %v1356_v50 }
 0x135   :  { %1207 = vst [vmem:[#allocation2 + $0x118] sm:$0xff] %v1157_v53  ;;  %v1300_v54 = vround.rtne.f32 %v209_v9  ;;  %v956_v58 = vand.u32 2, %v1356_v50  ;;  %v1056_v41 = vadd.s32 1, %v1356_v50  ;;  %v1299_v13 = vround.rtne.f32 %v208_v55 }
 0x136   :  { %v506_v56 = vmul.f32 %v481_v61, %v431_v4  ;;  %v681_v0 = vmul.f32 %v1272_v38, %v431_v4  ;;  %v781_v57 = vmul.f32 0.5, %v431_v4  ;;  %v2014_v6 = vmul.f32 %v1502_v31, %v148_v39 }
 0x137   :  { %v259_v43 = vmul.f32 1.5703125, %v1300_v54  ;;  %v309_v2 = vmul.f32 0.0004837513, %v1300_v54  ;;  %v359_v10 = vmul.f32 7.54979e-08, %v1300_v54  ;;  %v1365_v14 = vcvt.f32.s32 %v209_v9 }
 0x138   :  { %v1247_v42 = vadd.f32 -0.16666655, %v506_v56  ;;  %v706_v62 = vadd.f32 0.041666646, %v681_v0  ;;  %v258_v17 = vmul.f32 1.5703125, %v1299_v13  ;;  %vm881_vm3 = vcmp.eq.s32.totalorder %v856_v24, 1 }
 0x139   :  { %v284_v28 = vsub.f32 %v184_v33, %v259_v43  ;;  %vm2017_vm4 = vcmp.eq.s32.totalorder %v956_v58, 2  ;;  %v308_v27 = vmul.f32 0.0004837513, %v1299_v13  ;;  %v1081_v19 = vand.u32 2, %v1056_v41 }
 0x13a   :  { %v556_v5 = vmul.f32 %v1247_v42, %v431_v4  ;;  %v756_v60 = vmul.f32 %v731_v63, %v706_v62  ;;  %v283_v26 = vsub.f32 %v183_v45, %v258_v17  ;;  %v2025_v18 = vmul.f32 0.63661975, %v2014_v6 }
 0x13b   :  { %v334_v7 = vsub.f32 %v284_v28, %v309_v2  ;;  %v1059_v11 = vadd.s32 1, %v1365_v14  ;;  %v2029_v30 = vcvt.f32.s32 %v208_v55  ;;  %v358_v12 = vmul.f32 7.54979e-08, %v1299_v13 }
 0x13c   :  { %v581_v3 = vmul.f32 %v556_v5, %v1998_v32  ;;  %v806_v21 = vsub.f32 %v756_v60, %v781_v57  ;;  %v333_v16 = vsub.f32 %v283_v26, %v308_v27  ;;  %v1302_v33 = vround.rtne.f32 %v2025_v18 }
 0x13d   :  { %v2021_v22 = vsub.f32 %v334_v7, %v359_v10  ;;  %vm1106_vm5 = vcmp.eq.s32.totalorder %v1081_v19, 2  ;;  %v859_v44 = vand.u32 1, %v1365_v14  ;;  %v2035_v45 = vmul.f32 %v1502_v31, %v143_v15 }
 0x13e   :  { %v606_v20 = vadd.f32 %v581_v3, %v1998_v32  ;;  %v831_v23 = vadd.f32 1.0, %v806_v21  ;;  %v2032_v4 = vsub.f32 %v333_v16, %v358_v12  ;;  %v959_v48 = vand.u32 2, %v1365_v14 }
 0x13f   :  { %v434_v59 = vmul.f32 %v2021_v22, %v2021_v22  ;;  %v1084_v49 = vand.u32 2, %v1059_v11  ;;  %v261_v29 = vmul.f32 1.5703125, %v1302_v33  ;;  %v858_v52 = vand.u32 1, %v2029_v30 }
 0x140   :  { %v906_v34 = vsel %vm881_vm3, %v831_v23, %v606_v20  ;;  %v931_v1 = vsel %vm881_vm3, %v606_v20, %v831_v23  ;;  %v433_v51 = vmul.f32 %v2032_v4, %v2032_v4  ;;  %v1058_v53 = vadd.s32 1, %v2029_v30 }
 0x141   :  { %v1006_v35 = vsub.f32 0.0, %v906_v34  ;;  %v1131_v32 = vsub.f32 0.0, %v931_v1  ;;  %v459_v36 = vmul.f32 -0.00019515296, %v434_v59  ;;  %v634_v37 = vmul.f32 2.4433157e-05, %v434_v59 }
 0x142   :  { %v734_v61 = vmul.f32 %v434_v59, %v434_v59  ;;  %v784_v38 = vmul.f32 0.5, %v434_v59  ;;  %vm2043_vm6 = vcmp.eq.s32.totalorder %v859_v44, 1  ;;  %v458_v55 = vmul.f32 -0.00019515296, %v433_v51 }
 0x143   :  { %v1031_v46 = vsel %vm2017_vm4, %v1006_v35, %v906_v34  ;;  %v1156_v25 = vsel %vm1106_vm5, %v1131_v32, %v931_v1  ;;  %v484_v47 = vadd.f32 0.008332161, %v459_v36  ;;  %v1275_v40 = vadd.f32 -0.0013887316, %v634_v37  ;;  %v158_v37 = vpop.permute.xlu1 %157 }
 0x144   :  { %1181 = vst [vmem:[#allocation2 + $0x100] sm:$0xff] %v1031_v46  ;;  %1206 = vst [vmem:[#allocation2 + $0x108] sm:$0xff] %v1156_v25  ;;  %v633_v56 = vmul.f32 2.4433157e-05, %v433_v51  ;;  %v286_v43 = vsub.f32 %v2014_v6, %v261_v29  ;;  %v311_v39 = vmul.f32 0.0004837513, %v1302_v33  ;;  %vm2048_vm7 = vcmp.eq.s32.totalorder %v959_v48, 2 }
 0x145   :  { %v509_v50 = vmul.f32 %v484_v47, %v434_v59  ;;  %v684_v9 = vmul.f32 %v1275_v40, %v434_v59  ;;  %v483_v42 = vadd.f32 0.008332161, %v458_v55  ;;  %v361_v63 = vmul.f32 7.54979e-08, %v1302_v33 }
 0x146   :  { %v1274_v62 = vadd.f32 -0.0013887316, %v633_v56  ;;  %v336_v2 = vsub.f32 %v286_v43, %v311_v39  ;;  %v2053_v13 = vmul.f32 0.63661975, %v2035_v45  ;;  %vm2055_vm8 = vcmp.eq.s32.totalorder %v1084_v49, 2 }
 0x147   :  { %v1250_v0 = vadd.f32 -0.16666655, %v509_v50  ;;  %v709_v24 = vadd.f32 0.041666646, %v684_v9  ;;  %v508_v60 = vmul.f32 %v483_v42, %v433_v51  ;;  %v958_v6 = vand.u32 2, %v2029_v30 }
 0x148   :  { %v683_v57 = vmul.f32 %v1274_v62, %v433_v51  ;;  %vm2061_vm9 = vcmp.eq.s32.totalorder %v858_v52, 1  ;;  %v2065_v17 = vsub.f32 %v336_v2, %v361_v63  ;;  %v1301_v3 = vround.rtne.f32 %v2053_v13 }
 0x149   :  { %v559_v58 = vmul.f32 %v1250_v0, %v434_v59  ;;  %v759_v41 = vmul.f32 %v734_v61, %v709_v24  ;;  %v1249_v21 = vadd.f32 -0.16666655, %v508_v60  ;;  %v733_v26 = vmul.f32 %v433_v51, %v433_v51 }
 0x14a   :  { %v708_v8 = vadd.f32 0.041666646, %v683_v57  ;;  %v1083_v27 = vand.u32 2, %v1058_v53  ;;  %v2070_v19 = vcvt.f32.s32 %v2025_v18  ;;  %v436_v59 = vmul.f32 %v2065_v17, %v2065_v17  ;;  %v153_v53 = vpop.permute.xlu0 %152 }
 0x14b   :  { %v584_v7 = vmul.f32 %v559_v58, %v2021_v22  ;;  %v809_v10 = vsub.f32 %v759_v41, %v784_v38  ;;  %v558_v11 = vmul.f32 %v1249_v21, %v433_v51  ;;  %v783_v30 = vmul.f32 0.5, %v433_v51 }
 0x14c   :  { %v758_v16 = vmul.f32 %v733_v26, %v708_v8  ;;  %vm2074_vm10 = vcmp.eq.s32.totalorder %v958_v6, 2  ;;  %v260_v34 = vmul.f32 1.5703125, %v1301_v3  ;;  %v461_v12 = vmul.f32 -0.00019515296, %v436_v59 }
 0x14d   :  { %v609_v20 = vadd.f32 %v584_v7, %v2021_v22  ;;  %v834_v23 = vadd.f32 1.0, %v809_v10  ;;  %v636_v18 = vmul.f32 2.4433157e-05, %v436_v59  ;;  %v583_v32 = vmul.f32 %v558_v11, %v2032_v4 }
 0x14e   :  { %v808_v36 = vsub.f32 %v758_v16, %v783_v30  ;;  %vm2083_vm11 = vcmp.eq.s32.totalorder %v1083_v27, 2  ;;  %v486_v46 = vadd.f32 0.008332161, %v461_v12  ;;  %v861_v47 = vand.u32 1, %v2070_v19  ;;  %v163_v6 = vpop.permute.xlu0 %162 }
 0x14f   :  { %v909_v1 = vsel %vm2043_vm6, %v834_v23, %v609_v20  ;;  %v934_v22 = vsel %vm2043_vm6, %v609_v20, %v834_v23  ;;  %v1277_v25 = vadd.f32 -0.0013887316, %v636_v18  ;;  %v608_v49 = vadd.f32 %v583_v32, %v2032_v4 }
 0x150   :  { %v1009_v33 = vsub.f32 0.0, %v909_v1  ;;  %v1134_v35 = vsub.f32 0.0, %v934_v22  ;;  %v833_v51 = vadd.f32 1.0, %v808_v36  ;;  %v511_v29 = vmul.f32 %v486_v46, %v436_v59 }
 0x151   :  { %v686_v50 = vmul.f32 %v1277_v25, %v436_v59  ;;  %v285_v9 = vsub.f32 %v2035_v45, %v260_v34  ;;  %v188_v52 = vmul.f32 %v1502_v31, %v158_v37  ;;  %v736_v54 = vmul.f32 %v436_v59, %v436_v59 }
 0x152   :  { %v1034_v40 = vsel %vm2048_vm7, %v1009_v33, %v909_v1  ;;  %v1159_v48 = vsel %vm2055_vm8, %v1134_v35, %v934_v22  ;;  %v908_v61 = vsel %vm2061_vm9, %v833_v51, %v608_v49  ;;  %v933_v38 = vsel %vm2061_vm9, %v608_v49, %v833_v51 }
 0x153   :  { %1184 = vst [vmem:[#allocation2 + $0x130] sm:$0xff] %v1034_v40  ;;  %1209 = vst [vmem:[#allocation2 + $0x138] sm:$0xff] %v1159_v48  ;;  %v310_v55 = vmul.f32 0.0004837513, %v1301_v3  ;;  %v1008_v56 = vsub.f32 0.0, %v908_v61  ;;  %v1133_v4 = vsub.f32 0.0, %v933_v38  ;;  %v786_v43 = vmul.f32 0.5, %v436_v59 }
 0x154   :  { %v1252_v0 = vadd.f32 -0.16666655, %v511_v29  ;;  %v711_v24 = vadd.f32 0.041666646, %v686_v50  ;;  %v1061_v39 = vadd.s32 1, %v2070_v19  ;;  %v187_v57 = vmul.f32 %v1502_v31, %v153_v53 }
 0x155   :  { %v335_v42 = vsub.f32 %v285_v9, %v310_v55  ;;  %v360_v45 = vmul.f32 7.54979e-08, %v1301_v3  ;;  %v1033_v62 = vsel %vm2074_vm10, %v1008_v56, %v908_v61  ;;  %v1158_v63 = vsel %vm2083_vm11, %v1133_v4, %v933_v38 }
 0x156   :  { %v561_v58 = vmul.f32 %v1252_v0, %v436_v59  ;;  %v761_v41 = vmul.f32 %v736_v54, %v711_v24  ;;  %1183 = vst [vmem:[#allocation2 + $0x120] sm:$0xff] %v1033_v62  ;;  %1208 = vst [vmem:[#allocation2 + $0x128] sm:$0xff] %v1158_v63  ;;  %v213_v2 = vmul.f32 0.63661975, %v188_v52  ;;  %v961_v7 = vand.u32 2, %v2070_v19 }
 0x157   :  { %v385_v28 = vsub.f32 %v335_v42, %v360_v45  ;;  %vm886_vm12 = vcmp.eq.s32.totalorder %v861_v47, 1  ;;  %v1086_v8 = vand.u32 2, %v1061_v39  ;;  %v1368_v26 = vcvt.f32.s32 %v2053_v13 }
 0x158   :  { %v586_v5 = vmul.f32 %v561_v58, %v2065_v17  ;;  %v811_v60 = vsub.f32 %v761_v41, %v786_v43  ;;  %v1304_v14 = vround.rtne.f32 %v213_v2  ;;  %v2110_v23 = vmul.f32 %v1502_v31, %v163_v6 }
 0x159   :  { %v435_v10 = vmul.f32 %v385_v28, %v385_v28  ;;  %v2112_v30 = vmul.f32 0.63661975, %v187_v57  ;;  %vm986_vm13 = vcmp.eq.s32.totalorder %v961_v7, 2  ;;  %vm1111_vm14 = vcmp.eq.s32.totalorder %v1086_v8, 2 }
 0x15a   :  { %v611_v3 = vadd.f32 %v586_v5, %v2065_v17  ;;  %v836_v21 = vadd.f32 1.0, %v811_v60  ;;  %v263_v16 = vmul.f32 1.5703125, %v1304_v14  ;;  %v313_v22 = vmul.f32 0.0004837513, %v1304_v14 }
 0x15b   :  { %v460_v27 = vmul.f32 -0.00019515296, %v435_v10  ;;  %v635_v20 = vmul.f32 2.4433157e-05, %v435_v10  ;;  %v1060_v31 = vadd.s32 1, %v1368_v26  ;;  %v735_v46 = vmul.f32 %v435_v10, %v435_v10 }
 0x15c   :  { %v911_v59 = vsel %vm886_vm12, %v836_v21, %v611_v3  ;;  %v936_v11 = vsel %vm886_vm12, %v611_v3, %v836_v21  ;;  %v288_v17 = vsub.f32 %v188_v52, %v263_v16  ;;  %v363_v32 = vmul.f32 7.54979e-08, %v1304_v14 }
 0x15d   :  { %v1011_v19 = vsub.f32 0.0, %v911_v59  ;;  %v1136_v15 = vsub.f32 0.0, %v936_v11  ;;  %v485_v34 = vadd.f32 0.008332161, %v460_v27  ;;  %v1276_v1 = vadd.f32 -0.0013887316, %v635_v20 }
 0x15e   :  { %v338_v35 = vsub.f32 %v288_v17, %v313_v22  ;;  %v2115_v36 = vmul.f32 0.63661975, %v2110_v23  ;;  %v1303_v25 = vround.rtne.f32 %v2112_v30  ;;  %v860_v47 = vand.u32 1, %v1368_v26 }
 0x15f   :  { %v1036_v12 = vsel %vm986_vm13, %v1011_v19, %v911_v59  ;;  %v1161_v13 = vsel %vm1111_vm14, %v1136_v15, %v936_v11  ;;  %v510_v18 = vmul.f32 %v485_v34, %v435_v10  ;;  %v685_v33 = vmul.f32 %v1276_v1, %v435_v10 }
 0x160   :  { %1186 = vst [vmem:[#allocation2 + $0x150] sm:$0xff] %v1036_v12  ;;  %1211 = vst [vmem:[#allocation2 + $0x158] sm:$0xff] %v1161_v13  ;;  %v960_v40 = vand.u32 2, %v1368_v26  ;;  %v388_v48 = vsub.f32 %v338_v35, %v363_v32  ;;  %v785_v29 = vmul.f32 0.5, %v435_v10  ;;  %v262_v50 = vmul.f32 1.5703125, %v1303_v25 }
 0x161   :  { %v1251_v37 = vadd.f32 -0.16666655, %v510_v18  ;;  %v710_v44 = vadd.f32 0.041666646, %v685_v33  ;;  %v1085_v9 = vand.u32 2, %v1060_v31  ;;  %v1377_v52 = vcvt.f32.s32 %v213_v2 }
 0x162   :  { %v438_v53 = vmul.f32 %v388_v48, %v388_v48  ;;  %v1305_v61 = vround.rtne.f32 %v2115_v36  ;;  %v287_v55 = vsub.f32 %v187_v57, %v262_v50  ;;  %v312_v56 = vmul.f32 0.0004837513, %v1303_v25 }
 0x163   :  { %v560_v49 = vmul.f32 %v1251_v37, %v435_v10  ;;  %v760_v51 = vmul.f32 %v735_v46, %v710_v44  ;;  %vm885_vm15 = vcmp.eq.s32.totalorder %v860_v47, 1  ;;  %vm2119_vm0 = vcmp.eq.s32.totalorder %v960_v40, 2 }
 0x164   :  { %v463_v0 = vmul.f32 -0.00019515296, %v438_v53  ;;  %v638_v24 = vmul.f32 2.4433157e-05, %v438_v53  ;;  %v337_v42 = vsub.f32 %v287_v55, %v312_v56  ;;  %v362_v45 = vmul.f32 7.54979e-08, %v1303_v25 }
 0x165   :  { %v585_v38 = vmul.f32 %v560_v49, %v385_v28  ;;  %v810_v54 = vsub.f32 %v760_v51, %v785_v29  ;;  %vm2123_vm1 = vcmp.eq.s32.totalorder %v1085_v9, 2  ;;  %v863_v41 = vand.u32 1, %v1377_v52 }
 0x166   :  { %v488_v63 = vadd.f32 0.008332161, %v463_v0  ;;  %v1279_v58 = vadd.f32 -0.0013887316, %v638_v24  ;;  %v2127_v60 = vsub.f32 %v337_v42, %v362_v45  ;;  %v264_v57 = vmul.f32 1.5703125, %v1305_v61 }
 0x167   :  { %v610_v43 = vadd.f32 %v585_v38, %v385_v28  ;;  %v835_v39 = vadd.f32 1.0, %v810_v54  ;;  %v738_v28 = vmul.f32 %v438_v53, %v438_v53  ;;  %v314_v8 = vmul.f32 0.0004837513, %v1305_v61 }
 0x168   :  { %v513_v10 = vmul.f32 %v488_v63, %v438_v53  ;;  %v688_v14 = vmul.f32 %v1279_v58, %v438_v53  ;;  %v437_v3 = vmul.f32 %v2127_v60, %v2127_v60  ;;  %v289_v21 = vsub.f32 %v2110_v23, %v264_v57 }
 0x169   :  { %v910_v2 = vsel %vm885_vm15, %v835_v39, %v610_v43  ;;  %v935_v5 = vsel %vm885_vm15, %v610_v43, %v835_v39  ;;  %v963_v11 = vand.u32 2, %v1377_v52  ;;  %v1063_v16 = vadd.s32 1, %v1377_v52 }
 0x16a   :  { %v1010_v6 = vsub.f32 0.0, %v910_v2  ;;  %v1135_v7 = vsub.f32 0.0, %v935_v5  ;;  %v1254_v20 = vadd.f32 -0.16666655, %v513_v10  ;;  %v713_v59 = vadd.f32 0.041666646, %v688_v14 }
 0x16b   :  { %v462_v19 = vmul.f32 -0.00019515296, %v437_v3  ;;  %v637_v15 = vmul.f32 2.4433157e-05, %v437_v3  ;;  %v788_v17 = vmul.f32 0.5, %v438_v53  ;;  %v339_v22 = vsub.f32 %v289_v21, %v314_v8 }
 0x16c   :  { %v1035_v26 = vsel %vm2119_vm0, %v1010_v6, %v910_v2  ;;  %v1160_v27 = vsel %vm2123_vm1, %v1135_v7, %v935_v5  ;;  %v563_v34 = vmul.f32 %v1254_v20, %v438_v53  ;;  %v763_v1 = vmul.f32 %v738_v28, %v713_v59 }
 0x16d   :  { %1185 = vst [vmem:[#allocation2 + $0x140] sm:$0xff] %v1035_v26  ;;  %1210 = vst [vmem:[#allocation2 + $0x148] sm:$0xff] %v1160_v27  ;;  %v487_v23 = vadd.f32 0.008332161, %v462_v19  ;;  %v1278_v12 = vadd.f32 -0.0013887316, %v637_v15  ;;  %v1374_v31 = vcvt.f32.s32 %v2112_v30  ;;  %v737_v51 = vmul.f32 %v437_v3, %v437_v3 }
 0x16e   :  { %v364_v13 = vmul.f32 7.54979e-08, %v1305_v61  ;;  %v588_v18 = vmul.f32 %v563_v34, %v388_v48  ;;  %v813_v33 = vsub.f32 %v763_v1, %v788_v17  ;;  %vm888_vm2 = vcmp.eq.s32.totalorder %v863_v41, 1 }
 0x16f   :  { %v512_v35 = vmul.f32 %v487_v23, %v437_v3  ;;  %v687_v32 = vmul.f32 %v1278_v12, %v437_v3  ;;  %vm2137_vm3 = vcmp.eq.s32.totalorder %v963_v11, 2  ;;  %v1088_v47 = vand.u32 2, %v1063_v16 }
 0x170   :  { %v389_v37 = vsub.f32 %v339_v22, %v364_v13  ;;  %v613_v44 = vadd.f32 %v588_v18, %v388_v48  ;;  %v838_v46 = vadd.f32 1.0, %v813_v33  ;;  %v787_v52 = vmul.f32 0.5, %v437_v3 }
 0x171   :  { %v1253_v40 = vadd.f32 -0.16666655, %v512_v35  ;;  %v712_v49 = vadd.f32 0.041666646, %v687_v32  ;;  %v1062_v53 = vadd.s32 1, %v1374_v31  ;;  %vm1113_vm4 = vcmp.eq.s32.totalorder %v1088_v47, 2 }
 0x172   :  { %v439_v29 = vmul.f32 %v389_v37, %v389_v37  ;;  %v913_v50 = vsel %vm888_vm2, %v838_v46, %v613_v44  ;;  %v938_v9 = vsel %vm888_vm2, %v613_v44, %v838_v46  ;;  %v862_v48 = vand.u32 1, %v1374_v31 }
 0x173   :  { %v1013_v30 = vsub.f32 0.0, %v913_v50  ;;  %v1138_v61 = vsub.f32 0.0, %v938_v9  ;;  %v562_v38 = vmul.f32 %v1253_v40, %v437_v3  ;;  %v762_v54 = vmul.f32 %v737_v51, %v712_v49 }
 0x174   :  { %v464_v55 = vmul.f32 -0.00019515296, %v439_v29  ;;  %v639_v56 = vmul.f32 2.4433157e-05, %v439_v29  ;;  %v1380_v39 = vcvt.f32.s32 %v2115_v36  ;;  %v962_v58 = vand.u32 2, %v1374_v31 }
 0x175   :  { %v1038_v4 = vsel %vm2137_vm3, %v1013_v30, %v913_v50  ;;  %v1163_v0 = vsel %vm1113_vm4, %v1138_v61, %v938_v9  ;;  %v587_v24 = vmul.f32 %v562_v38, %v2127_v60  ;;  %v812_v43 = vsub.f32 %v762_v54, %v787_v52 }
 0x176   :  { %1188 = vst [vmem:[#allocation2 + $0x170] sm:$0xff] %v1038_v4  ;;  %1213 = vst [vmem:[#allocation2 + $0x178] sm:$0xff] %v1163_v0  ;;  %v489_v42 = vadd.f32 0.008332161, %v464_v55  ;;  %v1280_v45 = vadd.f32 -0.0013887316, %v639_v56  ;;  %v739_v7 = vmul.f32 %v439_v29, %v439_v29 }
 0x177   :  { %v612_v62 = vadd.f32 %v587_v24, %v2127_v60  ;;  %v837_v63 = vadd.f32 1.0, %v812_v43  ;;  %v1087_v41 = vand.u32 2, %v1062_v53  ;;  %vm887_vm5 = vcmp.eq.s32.totalorder %v862_v48, 1 }
 0x178   :  { %v514_v2 = vmul.f32 %v489_v42, %v439_v29  ;;  %v689_v5 = vmul.f32 %v1280_v45, %v439_v29  ;;  %vm987_vm6 = vcmp.eq.s32.totalorder %v962_v58, 2  ;;  %v789_v36 = vmul.f32 0.5, %v439_v29 }
 0x179   :  { %v912_v57 = vsel %vm887_vm5, %v837_v63, %v612_v62  ;;  %v937_v6 = vsel %vm887_vm5, %v612_v62, %v837_v63  ;;  %vm1112_vm7 = vcmp.eq.s32.totalorder %v1087_v41, 2  ;;  %v1064_v21 = vadd.s32 1, %v1380_v39 }
 0x17a   :  { %v1012_v10 = vsub.f32 0.0, %v912_v57  ;;  %v1137_v14 = vsub.f32 0.0, %v937_v6  ;;  %v1255_v28 = vadd.f32 -0.16666655, %v514_v2  ;;  %v714_v3 = vadd.f32 0.041666646, %v689_v5 }
 0x17b   :  { %v864_v20 = vand.u32 1, %v1380_v39  ;;  %v964_v15 = vand.u32 2, %v1380_v39  ;;  %v1089_v34 = vand.u32 2, %v1064_v21 }
 0x17c   :  { %v1037_v8 = vsel %vm987_vm6, %v1012_v10, %v912_v57  ;;  %v1162_v26 = vsel %vm1112_vm7, %v1137_v14, %v937_v6  ;;  %v564_v60 = vmul.f32 %v1255_v28, %v439_v29  ;;  %v764_v27 = vmul.f32 %v739_v7, %v714_v3 }
 0x17d   :  { %1187 = vst [vmem:[#allocation2 + $0x160] sm:$0xff] %v1037_v8  ;;  %1212 = vst [vmem:[#allocation2 + $0x168] sm:$0xff] %v1162_v26  ;;  %vm889_vm8 = vcmp.eq.s32.totalorder %v864_v20, 1  ;;  %vm989_vm9 = vcmp.eq.s32.totalorder %v964_v15, 2  ;;  %vm1114_vm10 = vcmp.eq.s32.totalorder %v1089_v34, 2 }
 0x17e   :  { %v589_v59 = vmul.f32 %v564_v60, %v389_v37  ;;  %v814_v11 = vsub.f32 %v764_v27, %v789_v36 }
 0x180   :  { %v614_v16 = vadd.f32 %v589_v59, %v389_v37  ;;  %v839_v19 = vadd.f32 1.0, %v814_v11 }
 0x182   :  { %v914_v1 = vsel %vm889_vm8, %v839_v19, %v614_v16  ;;  %v939_v17 = vsel %vm889_vm8, %v614_v16, %v839_v19 }
 0x183   :  { %v1014_v22 = vsub.f32 0.0, %v914_v1  ;;  %v1139_v23 = vsub.f32 0.0, %v939_v17 }
 0x185   :  { %v1039_v12 = vsel %vm989_vm9, %v1014_v22, %v914_v1  ;;  %v1164_v13 = vsel %vm1114_vm10, %v1139_v23, %v939_v17 }
 0x186   :  { %1189 = vst [vmem:[#allocation2 + $0x180] sm:$0xff] %v1039_v12  ;;  %1214 = vst [vmem:[#allocation2 + $0x188] sm:$0xff] %v1164_v13 }
 0x187   :  { %1400 = shalt.err (!%p1397_p4)
}
 0x188   :  { %s1401_s2 = scalar_lea.hbm %s2159_s1, 6400 }
 0x189   :  { %p1402_p5 = scmp.ne.s32.totalorder %s2159_s1, %s1401_s2  ;;  %p1405_p6 = scmp.lt.u32.totalorder %s1401_s2, %s2159_s1 }
 0x18b   :  { %p1407_p7 = pnand %p1405_p6, %p1402_p5 }
 0x18d   :  { %1410 = shalt.err (!%p1407_p7)
}
 0x18e   :  { %s1415_s7 = smov 256   ;;  %s1416_s8 = smov 16  }
 0x18f   :  { %1226 = dma.vmem_to_hbm [thread:$0]  %s1221_s27, 6400, %s2159_s1, [#allocation3], %s1415_s7, %s1415_s7, %s1416_s8  }
 0x190   :  { %1411 = dma.done.wait [#allocation3], 6400  }
 0x191   :  { %1412 = vsyncadd [#allocation3], 4294960896 }
 0x192   :  { %1230 = vsyncpa [#allocation3], 1 }

</bundles_post_ra>
